<compile_context>
chip_gen: v7x
topology: tpu7x:2x2x1
jax: 0.10.0
libtpu: 0.0.40
codegen_flags: <defaults>
</compile_context>

<pallas_src>
import functools

import jax
import jax.numpy as jnp
from jax.experimental import pallas as pl
from jax.experimental.pallas import tpu as pltpu

# ----------------------------------------------------------------------------
# Graph definition (copied from the PyTorch module)
# ----------------------------------------------------------------------------
edges = [('lsjc', 'lejc'), ('lejc', 'lwjc'), ('lwjc', 'lhjc'), ('rsjc', 'rejc'),
         ('rejc', 'rwjc'), ('rwjc', 'rhjc'), ('left_hip', 'lkjc'), ('lkjc', 'lajc'),
         ('right_hip', 'rkjc'), ('rkjc', 'rajc'), ('left_hip', 'lsjc'),
         ('right_hip', 'rsjc'), ('lsjc', 'rsjc'), ('left_hip', 'right_hip')]
node_names = ['lhjc', 'left_hip', 'lsjc', 'lejc', 'lkjc', 'lajc', 'lwjc',
              'rhjc', 'right_hip', 'rsjc', 'rejc', 'rkjc', 'rajc', 'rwjc']
node_to_idx = {name: i for i, name in enumerate(node_names)}
edge_index = [(node_to_idx[a], node_to_idx[b]) for a, b in edges]


def build_adjacency(num_nodes):
    a = jnp.zeros((num_nodes, num_nodes), jnp.float32)
    for i, j in edge_index:
        a = a.at[i, j].add(1.0)   # x_new[i] += layer(x[j])
        a = a.at[j, i].add(1.0)   # x_new[j] += layer(x[i])
    return a


# ----------------------------------------------------------------------------
# Fused kernel: GNN (proj + 2 layers) + GRU + FC, single program, all in VMEM
# ----------------------------------------------------------------------------
def fused_gnn_gru_kernel(x_ref, adj_ref, wp_ref, bp_ref, w1_ref, b1_ref,
                         w2_ref, b2_ref, wi_ref, bi_ref, wh_ref, bhn_ref,
                         wfc_ref, bfc_ref, out_ref, *,
                         num_nodes, num_samples, batch, seq_len, hidden):
    N, M, B, T, H = num_nodes, num_samples, batch, seq_len, hidden

    # ------------------ GNN stage: big batched matmuls -----------------------
    # x rows are ordered (n, t, b); adj_ref holds kron(adj, I_M), so the edge
    # accumulation over ALL samples is one block-diagonal (N*M, N*M) matmul.
    a_big = adj_ref[...]                                              # (N*M, N*M)
    h = jnp.dot(x_ref[...], wp_ref[...],
                preferred_element_type=jnp.float32) + bp_ref[...]     # (N*M, H)

    lin = jnp.dot(h, w1_ref[...], preferred_element_type=jnp.float32) + b1_ref[...]
    h = jnp.maximum(jnp.dot(a_big, lin, preferred_element_type=jnp.float32), 0.0)

    lin = jnp.dot(h, w2_ref[...], preferred_element_type=jnp.float32) + b2_ref[...]
    h = jnp.maximum(jnp.dot(a_big, lin, preferred_element_type=jnp.float32), 0.0)

    # -------- hoisted GRU input-gate matmul (all T*B samples at once) --------
    # gates[m] = sum_n h[(n, m), :] @ Wi_cat[n*H:(n+1)*H, :]  (+ folded biases)
    gates = bi_ref[...]                                               # (1, 3H) broadcast
    for n in range(N):
        gates = gates + jnp.dot(h[n * M:(n + 1) * M, :],
                                wi_ref[n * H:(n + 1) * H, :],
                                preferred_element_type=jnp.float32)   # (M, 3H)

    # ------------- GRU recurrence: fully unrolled, tiny matmuls --------------
    wh = wh_ref[...]                                                  # (H, 3H)
    bhn = bhn_ref[...]                                                # (1, H)
    hs = jnp.zeros((B, H), jnp.float32)
    for t in range(T):
        g_t = gates[t * B:(t + 1) * B, :]                             # (B, 3H)
        hg = jnp.dot(hs, wh, preferred_element_type=jnp.float32)      # (B, 3H)
        r = jax.nn.sigmoid(g_t[:, 0:H] + hg[:, 0:H])
        z = jax.nn.sigmoid(g_t[:, H:2 * H] + hg[:, H:2 * H])
        n_t = jnp.tanh(g_t[:, 2 * H:3 * H] + r * (hg[:, 2 * H:3 * H] + bhn))
        hs = (1.0 - z) * n_t + z * hs

    # ------------------------- final FC on last hidden -----------------------
    out_ref[...] = (jnp.dot(hs, wfc_ref[...], preferred_element_type=jnp.float32)
                    + bfc_ref[...])


def gnn_gru_model(x, params):
    B, T, N, D = x.shape
    H = params["wp"].shape[1]
    O = params["wfc"].shape[1]
    M = T * B

    # Node-major layout: rows ordered (n, t, b) so
    #   * the adjacency step is one block-diagonal matmul, and
    #   * per-time-step GRU slices are contiguous blocks of B rows.
    x2 = jnp.transpose(x, (2, 1, 0, 3)).reshape(N * M, D)
    a_big = jnp.kron(params["adj"], jnp.eye(M, dtype=jnp.float32))    # (N*M, N*M)

    # Lane-dense packed GRU weights (r | z | n) and pre-folded biases.
    wi_cat = jnp.concatenate([params["wir"], params["wiz"], params["win"]], axis=1)
    wh_cat = jnp.concatenate([params["whr"], params["whz"], params["whn"]], axis=1)
    bi_cat = jnp.concatenate([params["bir"] + params["bhr"],
                              params["biz"] + params["bhz"],
                              params["bin"]], axis=1)                 # bhn stays separate

    kernel = functools.partial(fused_gnn_gru_kernel, num_nodes=N, num_samples=M,
                               batch=B, seq_len=T, hidden=H)
    vmem = pl.BlockSpec(memory_space=pltpu.MemorySpace.VMEM)
    return pl.pallas_call(
        kernel,
        out_shape=jax.ShapeDtypeStruct((B, O), jnp.float32),
        in_specs=[vmem] * 14,
        out_specs=vmem,
    )(x2, a_big, params["wp"], params["bp"], params["w1"], params["b1"],
      params["w2"], params["b2"], wi_cat, bi_cat, wh_cat, params["bhn"],
      params["wfc"], params["bfc"])


# ----------------------------------------------------------------------------
# Pure-JAX reference (mirrors PyTorch semantics) for validation
# ----------------------------------------------------------------------------
def reference(x, params):
    B, T, N, D = x.shape
    adj = params["adj"]
    h = x @ params["wp"] + params["bp"]
    for wk, bk in (("w1", "b1"), ("w2", "b2")):
        lin = h @ params[wk] + params[bk]
        h = jax.nn.relu(jnp.einsum("ij,btjh->btih", adj, lin))
    xf = h.reshape(B, T, -1)
    H = params["whr"].shape[0]
    hs = jnp.zeros((B, H), jnp.float32)
    for t in range(T):
        xt = xf[:, t]
        r = jax.nn.sigmoid(xt @ params["wir"] + params["bir"]
                           + hs @ params["whr"] + params["bhr"])
        z = jax.nn.sigmoid(xt @ params["wiz"] + params["biz"]
                           + hs @ params["whz"] + params["bhz"])
        n = jnp.tanh(xt @ params["win"] + params["bin"]
                     + r * (hs @ params["whn"] + params["bhn"]))
        hs = (1.0 - z) * n + z * hs
    return hs @ params["wfc"] + params["bfc"]


# ----------------------------------------------------------------------------
# Deterministic parameter init
# ----------------------------------------------------------------------------
def init_params(key, input_dim, num_nodes, hidden_dim, output_dim):
    ks = jax.random.split(key, 20)
    scale = 0.1
    NH = hidden_dim * num_nodes

    def rnd(k, shape):
        return jax.random.normal(k, shape, jnp.float32) * scale

    return {
        "adj": build_adjacency(num_nodes),
        # node_proj (weights stored pre-transposed: x @ W)
        "wp": rnd(ks[0], (input_dim, hidden_dim)),
        "bp": rnd(ks[1], (1, hidden_dim)),
        # gnn layers
        "w1": rnd(ks[2], (hidden_dim, hidden_dim)),
        "b1": rnd(ks[3], (1, hidden_dim)),
        "w2": rnd(ks[4], (hidden_dim, hidden_dim)),
        "b2": rnd(ks[5], (1, hidden_dim)),
        # GRU (PyTorch gate order r, z, n; weights pre-transposed)
        "wir": rnd(ks[6], (NH, hidden_dim)),
        "wiz": rnd(ks[7], (NH, hidden_dim)),
        "win": rnd(ks[8], (NH, hidden_dim)),
        "whr": rnd(ks[9], (hidden_dim, hidden_dim)),
        "whz": rnd(ks[10], (hidden_dim, hidden_dim)),
        "whn": rnd(ks[11], (hidden_dim, hidden_dim)),
        "bir": rnd(ks[12], (1, hidden_dim)),
        "biz": rnd(ks[13], (1, hidden_dim)),
        "bin": rnd(ks[14], (1, hidden_dim)),
        "bhr": rnd(ks[15], (1, hidden_dim)),
        "bhz": rnd(ks[16], (1, hidden_dim)),
        "bhn": rnd(ks[17], (1, hidden_dim)),
        # fc
        "wfc": rnd(ks[18], (hidden_dim, output_dim)),
        "bfc": rnd(ks[19], (1, output_dim)),
    }


if __name__ == "__main__":
    B, T, N, D = 2, 8, 14, 3         # N=14 fixed by the graph, D=3 input_dim
    hidden_dim, output_dim = 32, 1   # small hidden for the example

    key = jax.random.PRNGKey(0)
    kx, kp = jax.random.split(key)
    x = jax.random.normal(kx, (B, T, N, D), jnp.float32)
    params = init_params(kp, D, N, hidden_dim, output_dim)

    out = jax.jit(gnn_gru_model)(x, params)
    out = jax.block_until_ready(out)

    ref = reference(x, params)
    assert out.shape == (B, output_dim)
    assert jnp.allclose(out, ref, atol=1e-4, rtol=1e-4), (out, ref)

    print("KERNEL_OK")
</pallas_src>

<mosaic_0001>
module attributes {stable_mosaic.version = 11 : i64} {
  func.func @fused_gnn_gru_kernel(%arg0: memref<224x3xf32, #tpu.memory_space<vmem>>, %arg1: memref<224x224xf32, #tpu.memory_space<vmem>>, %arg2: memref<3x32xf32, #tpu.memory_space<vmem>>, %arg3: memref<1x32xf32, #tpu.memory_space<vmem>>, %arg4: memref<32x32xf32, #tpu.memory_space<vmem>>, %arg5: memref<1x32xf32, #tpu.memory_space<vmem>>, %arg6: memref<32x32xf32, #tpu.memory_space<vmem>>, %arg7: memref<1x32xf32, #tpu.memory_space<vmem>>, %arg8: memref<448x96xf32, #tpu.memory_space<vmem>>, %arg9: memref<1x96xf32, #tpu.memory_space<vmem>>, %arg10: memref<32x96xf32, #tpu.memory_space<vmem>>, %arg11: memref<1x32xf32, #tpu.memory_space<vmem>>, %arg12: memref<32x1xf32, #tpu.memory_space<vmem>>, %arg13: memref<1x1xf32, #tpu.memory_space<vmem>>, %arg14: memref<2x1xf32, #tpu.memory_space<vmem>>) attributes {dimension_semantics = [], scalar_prefetch = 0 : i64, scratch_operands = 0 : i64, tpu.core_type = #tpu.core_type<tc>} {
    %c0 = arith.constant 0 : index
    %c0_0 = arith.constant 0 : index
    %0 = vector.load %arg1[%c0, %c0_0] : memref<224x224xf32, #tpu.memory_space<vmem>>, vector<224x224xf32>
    %c0_1 = arith.constant 0 : index
    %c0_2 = arith.constant 0 : index
    %1 = vector.load %arg0[%c0_1, %c0_2] : memref<224x3xf32, #tpu.memory_space<vmem>>, vector<224x3xf32>
    %c0_3 = arith.constant 0 : index
    %c0_4 = arith.constant 0 : index
    %2 = vector.load %arg2[%c0_3, %c0_4] : memref<3x32xf32, #tpu.memory_space<vmem>>, vector<3x32xf32>
    %cst = arith.constant dense<0.000000e+00> : vector<224x32xf32>
    %3 = tpu.matmul %1, %2, %cst {dimension_numbers = #tpu.dot_dimension_numbers<[1], [0], [0], [1], [0, 0, 1, 1], [], []>} : vector<224x3xf32>, vector<3x32xf32>, vector<224x32xf32> -> vector<224x32xf32>
    %c0_5 = arith.constant 0 : index
    %c0_6 = arith.constant 0 : index
    %4 = vector.load %arg3[%c0_5, %c0_6] : memref<1x32xf32, #tpu.memory_space<vmem>>, vector<1x32xf32>
    %5 = vector.broadcast %4 : vector<1x32xf32> to vector<224x32xf32>
    %6 = arith.addf %3, %5 : vector<224x32xf32>
    %c0_7 = arith.constant 0 : index
    %c0_8 = arith.constant 0 : index
    %7 = vector.load %arg4[%c0_7, %c0_8] : memref<32x32xf32, #tpu.memory_space<vmem>>, vector<32x32xf32>
    %cst_9 = arith.constant dense<0.000000e+00> : vector<224x32xf32>
    %8 = tpu.matmul %6, %7, %cst_9 {dimension_numbers = #tpu.dot_dimension_numbers<[1], [0], [0], [1], [0, 0, 1, 1], [], []>} : vector<224x32xf32>, vector<32x32xf32>, vector<224x32xf32> -> vector<224x32xf32>
    %c0_10 = arith.constant 0 : index
    %c0_11 = arith.constant 0 : index
    %9 = vector.load %arg5[%c0_10, %c0_11] : memref<1x32xf32, #tpu.memory_space<vmem>>, vector<1x32xf32>
    %10 = vector.broadcast %9 : vector<1x32xf32> to vector<224x32xf32>
    %11 = arith.addf %8, %10 : vector<224x32xf32>
    %cst_12 = arith.constant dense<0.000000e+00> : vector<224x32xf32>
    %12 = tpu.matmul %0, %11, %cst_12 {dimension_numbers = #tpu.dot_dimension_numbers<[1], [0], [0], [1], [0, 0, 1, 1], [], []>} : vector<224x224xf32>, vector<224x32xf32>, vector<224x32xf32> -> vector<224x32xf32>
    %cst_13 = arith.constant 0.000000e+00 : f32
    %13 = vector.broadcast %cst_13 : f32 to vector<224x32xf32>
    %14 = arith.maximumf %12, %13 : vector<224x32xf32>
    %c0_14 = arith.constant 0 : index
    %c0_15 = arith.constant 0 : index
    %15 = vector.load %arg6[%c0_14, %c0_15] : memref<32x32xf32, #tpu.memory_space<vmem>>, vector<32x32xf32>
    %cst_16 = arith.constant dense<0.000000e+00> : vector<224x32xf32>
    %16 = tpu.matmul %14, %15, %cst_16 {dimension_numbers = #tpu.dot_dimension_numbers<[1], [0], [0], [1], [0, 0, 1, 1], [], []>} : vector<224x32xf32>, vector<32x32xf32>, vector<224x32xf32> -> vector<224x32xf32>
    %c0_17 = arith.constant 0 : index
    %c0_18 = arith.constant 0 : index
    %17 = vector.load %arg7[%c0_17, %c0_18] : memref<1x32xf32, #tpu.memory_space<vmem>>, vector<1x32xf32>
    %18 = vector.broadcast %17 : vector<1x32xf32> to vector<224x32xf32>
    %19 = arith.addf %16, %18 : vector<224x32xf32>
    %cst_19 = arith.constant dense<0.000000e+00> : vector<224x32xf32>
    %20 = tpu.matmul %0, %19, %cst_19 {dimension_numbers = #tpu.dot_dimension_numbers<[1], [0], [0], [1], [0, 0, 1, 1], [], []>} : vector<224x224xf32>, vector<224x32xf32>, vector<224x32xf32> -> vector<224x32xf32>
    %cst_20 = arith.constant 0.000000e+00 : f32
    %21 = vector.broadcast %cst_20 : f32 to vector<224x32xf32>
    %22 = arith.maximumf %20, %21 : vector<224x32xf32>
    %c0_21 = arith.constant 0 : index
    %c0_22 = arith.constant 0 : index
    %23 = vector.load %arg9[%c0_21, %c0_22] : memref<1x96xf32, #tpu.memory_space<vmem>>, vector<1x96xf32>
    %24 = vector.extract_strided_slice %22 {offsets = [0, 0], sizes = [16, 32], strides = [1, 1]} : vector<224x32xf32> to vector<16x32xf32>
    %c0_23 = arith.constant 0 : index
    %c0_24 = arith.constant 0 : index
    %25 = vector.load %arg8[%c0_23, %c0_24] : memref<448x96xf32, #tpu.memory_space<vmem>>, vector<32x96xf32>
    %cst_25 = arith.constant dense<0.000000e+00> : vector<16x96xf32>
    %26 = tpu.matmul %24, %25, %cst_25 {dimension_numbers = #tpu.dot_dimension_numbers<[1], [0], [0], [1], [0, 0, 1, 1], [], []>} : vector<16x32xf32>, vector<32x96xf32>, vector<16x96xf32> -> vector<16x96xf32>
    %27 = vector.broadcast %23 : vector<1x96xf32> to vector<16x96xf32>
    %28 = arith.addf %27, %26 : vector<16x96xf32>
    %29 = vector.extract_strided_slice %22 {offsets = [16, 0], sizes = [16, 32], strides = [1, 1]} : vector<224x32xf32> to vector<16x32xf32>
    %c32 = arith.constant 32 : index
    %c0_26 = arith.constant 0 : index
    %30 = vector.load %arg8[%c32, %c0_26] : memref<448x96xf32, #tpu.memory_space<vmem>>, vector<32x96xf32>
    %cst_27 = arith.constant dense<0.000000e+00> : vector<16x96xf32>
    %31 = tpu.matmul %29, %30, %cst_27 {dimension_numbers = #tpu.dot_dimension_numbers<[1], [0], [0], [1], [0, 0, 1, 1], [], []>} : vector<16x32xf32>, vector<32x96xf32>, vector<16x96xf32> -> vector<16x96xf32>
    %32 = arith.addf %28, %31 : vector<16x96xf32>
    %33 = vector.extract_strided_slice %22 {offsets = [32, 0], sizes = [16, 32], strides = [1, 1]} : vector<224x32xf32> to vector<16x32xf32>
    %c64 = arith.constant 64 : index
    %c0_28 = arith.constant 0 : index
    %34 = vector.load %arg8[%c64, %c0_28] : memref<448x96xf32, #tpu.memory_space<vmem>>, vector<32x96xf32>
    %cst_29 = arith.constant dense<0.000000e+00> : vector<16x96xf32>
    %35 = tpu.matmul %33, %34, %cst_29 {dimension_numbers = #tpu.dot_dimension_numbers<[1], [0], [0], [1], [0, 0, 1, 1], [], []>} : vector<16x32xf32>, vector<32x96xf32>, vector<16x96xf32> -> vector<16x96xf32>
    %36 = arith.addf %32, %35 : vector<16x96xf32>
    %37 = vector.extract_strided_slice %22 {offsets = [48, 0], sizes = [16, 32], strides = [1, 1]} : vector<224x32xf32> to vector<16x32xf32>
    %c96 = arith.constant 96 : index
    %c0_30 = arith.constant 0 : index
    %38 = vector.load %arg8[%c96, %c0_30] : memref<448x96xf32, #tpu.memory_space<vmem>>, vector<32x96xf32>
    %cst_31 = arith.constant dense<0.000000e+00> : vector<16x96xf32>
    %39 = tpu.matmul %37, %38, %cst_31 {dimension_numbers = #tpu.dot_dimension_numbers<[1], [0], [0], [1], [0, 0, 1, 1], [], []>} : vector<16x32xf32>, vector<32x96xf32>, vector<16x96xf32> -> vector<16x96xf32>
    %40 = arith.addf %36, %39 : vector<16x96xf32>
    %41 = vector.extract_strided_slice %22 {offsets = [64, 0], sizes = [16, 32], strides = [1, 1]} : vector<224x32xf32> to vector<16x32xf32>
    %c128 = arith.constant 128 : index
    %c0_32 = arith.constant 0 : index
    %42 = vector.load %arg8[%c128, %c0_32] : memref<448x96xf32, #tpu.memory_space<vmem>>, vector<32x96xf32>
    %cst_33 = arith.constant dense<0.000000e+00> : vector<16x96xf32>
    %43 = tpu.matmul %41, %42, %cst_33 {dimension_numbers = #tpu.dot_dimension_numbers<[1], [0], [0], [1], [0, 0, 1, 1], [], []>} : vector<16x32xf32>, vector<32x96xf32>, vector<16x96xf32> -> vector<16x96xf32>
    %44 = arith.addf %40, %43 : vector<16x96xf32>
    %45 = vector.extract_strided_slice %22 {offsets = [80, 0], sizes = [16, 32], strides = [1, 1]} : vector<224x32xf32> to vector<16x32xf32>
    %c160 = arith.constant 160 : index
    %c0_34 = arith.constant 0 : index
    %46 = vector.load %arg8[%c160, %c0_34] : memref<448x96xf32, #tpu.memory_space<vmem>>, vector<32x96xf32>
    %cst_35 = arith.constant dense<0.000000e+00> : vector<16x96xf32>
    %47 = tpu.matmul %45, %46, %cst_35 {dimension_numbers = #tpu.dot_dimension_numbers<[1], [0], [0], [1], [0, 0, 1, 1], [], []>} : vector<16x32xf32>, vector<32x96xf32>, vector<16x96xf32> -> vector<16x96xf32>
    %48 = arith.addf %44, %47 : vector<16x96xf32>
    %49 = vector.extract_strided_slice %22 {offsets = [96, 0], sizes = [16, 32], strides = [1, 1]} : vector<224x32xf32> to vector<16x32xf32>
    %c192 = arith.constant 192 : index
    %c0_36 = arith.constant 0 : index
    %50 = vector.load %arg8[%c192, %c0_36] : memref<448x96xf32, #tpu.memory_space<vmem>>, vector<32x96xf32>
    %cst_37 = arith.constant dense<0.000000e+00> : vector<16x96xf32>
    %51 = tpu.matmul %49, %50, %cst_37 {dimension_numbers = #tpu.dot_dimension_numbers<[1], [0], [0], [1], [0, 0, 1, 1], [], []>} : vector<16x32xf32>, vector<32x96xf32>, vector<16x96xf32> -> vector<16x96xf32>
    %52 = arith.addf %48, %51 : vector<16x96xf32>
    %53 = vector.extract_strided_slice %22 {offsets = [112, 0], sizes = [16, 32], strides = [1, 1]} : vector<224x32xf32> to vector<16x32xf32>
    %c224 = arith.constant 224 : index
    %c0_38 = arith.constant 0 : index
    %54 = vector.load %arg8[%c224, %c0_38] : memref<448x96xf32, #tpu.memory_space<vmem>>, vector<32x96xf32>
    %cst_39 = arith.constant dense<0.000000e+00> : vector<16x96xf32>
    %55 = tpu.matmul %53, %54, %cst_39 {dimension_numbers = #tpu.dot_dimension_numbers<[1], [0], [0], [1], [0, 0, 1, 1], [], []>} : vector<16x32xf32>, vector<32x96xf32>, vector<16x96xf32> -> vector<16x96xf32>
    %56 = arith.addf %52, %55 : vector<16x96xf32>
    %57 = vector.extract_strided_slice %22 {offsets = [128, 0], sizes = [16, 32], strides = [1, 1]} : vector<224x32xf32> to vector<16x32xf32>
    %c256 = arith.constant 256 : index
    %c0_40 = arith.constant 0 : index
    %58 = vector.load %arg8[%c256, %c0_40] : memref<448x96xf32, #tpu.memory_space<vmem>>, vector<32x96xf32>
    %cst_41 = arith.constant dense<0.000000e+00> : vector<16x96xf32>
    %59 = tpu.matmul %57, %58, %cst_41 {dimension_numbers = #tpu.dot_dimension_numbers<[1], [0], [0], [1], [0, 0, 1, 1], [], []>} : vector<16x32xf32>, vector<32x96xf32>, vector<16x96xf32> -> vector<16x96xf32>
    %60 = arith.addf %56, %59 : vector<16x96xf32>
    %61 = vector.extract_strided_slice %22 {offsets = [144, 0], sizes = [16, 32], strides = [1, 1]} : vector<224x32xf32> to vector<16x32xf32>
    %c288 = arith.constant 288 : index
    %c0_42 = arith.constant 0 : index
    %62 = vector.load %arg8[%c288, %c0_42] : memref<448x96xf32, #tpu.memory_space<vmem>>, vector<32x96xf32>
    %cst_43 = arith.constant dense<0.000000e+00> : vector<16x96xf32>
    %63 = tpu.matmul %61, %62, %cst_43 {dimension_numbers = #tpu.dot_dimension_numbers<[1], [0], [0], [1], [0, 0, 1, 1], [], []>} : vector<16x32xf32>, vector<32x96xf32>, vector<16x96xf32> -> vector<16x96xf32>
    %64 = arith.addf %60, %63 : vector<16x96xf32>
    %65 = vector.extract_strided_slice %22 {offsets = [160, 0], sizes = [16, 32], strides = [1, 1]} : vector<224x32xf32> to vector<16x32xf32>
    %c320 = arith.constant 320 : index
    %c0_44 = arith.constant 0 : index
    %66 = vector.load %arg8[%c320, %c0_44] : memref<448x96xf32, #tpu.memory_space<vmem>>, vector<32x96xf32>
    %cst_45 = arith.constant dense<0.000000e+00> : vector<16x96xf32>
    %67 = tpu.matmul %65, %66, %cst_45 {dimension_numbers = #tpu.dot_dimension_numbers<[1], [0], [0], [1], [0, 0, 1, 1], [], []>} : vector<16x32xf32>, vector<32x96xf32>, vector<16x96xf32> -> vector<16x96xf32>
    %68 = arith.addf %64, %67 : vector<16x96xf32>
    %69 = vector.extract_strided_slice %22 {offsets = [176, 0], sizes = [16, 32], strides = [1, 1]} : vector<224x32xf32> to vector<16x32xf32>
    %c352 = arith.constant 352 : index
    %c0_46 = arith.constant 0 : index
    %70 = vector.load %arg8[%c352, %c0_46] : memref<448x96xf32, #tpu.memory_space<vmem>>, vector<32x96xf32>
    %cst_47 = arith.constant dense<0.000000e+00> : vector<16x96xf32>
    %71 = tpu.matmul %69, %70, %cst_47 {dimension_numbers = #tpu.dot_dimension_numbers<[1], [0], [0], [1], [0, 0, 1, 1], [], []>} : vector<16x32xf32>, vector<32x96xf32>, vector<16x96xf32> -> vector<16x96xf32>
    %72 = arith.addf %68, %71 : vector<16x96xf32>
    %73 = vector.extract_strided_slice %22 {offsets = [192, 0], sizes = [16, 32], strides = [1, 1]} : vector<224x32xf32> to vector<16x32xf32>
    %c384 = arith.constant 384 : index
    %c0_48 = arith.constant 0 : index
    %74 = vector.load %arg8[%c384, %c0_48] : memref<448x96xf32, #tpu.memory_space<vmem>>, vector<32x96xf32>
    %cst_49 = arith.constant dense<0.000000e+00> : vector<16x96xf32>
    %75 = tpu.matmul %73, %74, %cst_49 {dimension_numbers = #tpu.dot_dimension_numbers<[1], [0], [0], [1], [0, 0, 1, 1], [], []>} : vector<16x32xf32>, vector<32x96xf32>, vector<16x96xf32> -> vector<16x96xf32>
    %76 = arith.addf %72, %75 : vector<16x96xf32>
    %77 = vector.extract_strided_slice %22 {offsets = [208, 0], sizes = [16, 32], strides = [1, 1]} : vector<224x32xf32> to vector<16x32xf32>
    %c416 = arith.constant 416 : index
    %c0_50 = arith.constant 0 : index
    %78 = vector.load %arg8[%c416, %c0_50] : memref<448x96xf32, #tpu.memory_space<vmem>>, vector<32x96xf32>
    %cst_51 = arith.constant dense<0.000000e+00> : vector<16x96xf32>
    %79 = tpu.matmul %77, %78, %cst_51 {dimension_numbers = #tpu.dot_dimension_numbers<[1], [0], [0], [1], [0, 0, 1, 1], [], []>} : vector<16x32xf32>, vector<32x96xf32>, vector<16x96xf32> -> vector<16x96xf32>
    %80 = arith.addf %76, %79 : vector<16x96xf32>
    %c0_52 = arith.constant 0 : index
    %c0_53 = arith.constant 0 : index
    %81 = vector.load %arg10[%c0_52, %c0_53] : memref<32x96xf32, #tpu.memory_space<vmem>>, vector<32x96xf32>
    %c0_54 = arith.constant 0 : index
    %c0_55 = arith.constant 0 : index
    %82 = vector.load %arg11[%c0_54, %c0_55] : memref<1x32xf32, #tpu.memory_space<vmem>>, vector<1x32xf32>
    %cst_56 = arith.constant 0.000000e+00 : f32
    %83 = vector.broadcast %cst_56 : f32 to vector<2x32xf32>
    %84 = vector.extract_strided_slice %80 {offsets = [0, 0], sizes = [2, 96], strides = [1, 1]} : vector<16x96xf32> to vector<2x96xf32>
    %cst_57 = arith.constant dense<0.000000e+00> : vector<2x96xf32>
    %85 = tpu.matmul %83, %81, %cst_57 {dimension_numbers = #tpu.dot_dimension_numbers<[1], [0], [0], [1], [0, 0, 1, 1], [], []>} : vector<2x32xf32>, vector<32x96xf32>, vector<2x96xf32> -> vector<2x96xf32>
    %86 = vector.extract_strided_slice %84 {offsets = [0, 0], sizes = [2, 32], strides = [1, 1]} : vector<2x96xf32> to vector<2x32xf32>
    %87 = vector.extract_strided_slice %85 {offsets = [0, 0], sizes = [2, 32], strides = [1, 1]} : vector<2x96xf32> to vector<2x32xf32>
    %88 = arith.addf %86, %87 : vector<2x32xf32>
    %89 = arith.negf %88 : vector<2x32xf32>
    %90 = math.exp %89 : vector<2x32xf32>
    %cst_58 = arith.constant 1.000000e+00 : f32
    %91 = vector.broadcast %cst_58 : f32 to vector<2x32xf32>
    %92 = arith.addf %91, %90 : vector<2x32xf32>
    %93 = arith.divf %91, %92 : vector<2x32xf32>
    %94 = vector.extract_strided_slice %84 {offsets = [0, 32], sizes = [2, 32], strides = [1, 1]} : vector<2x96xf32> to vector<2x32xf32>
    %95 = vector.extract_strided_slice %85 {offsets = [0, 32], sizes = [2, 32], strides = [1, 1]} : vector<2x96xf32> to vector<2x32xf32>
    %96 = arith.addf %94, %95 : vector<2x32xf32>
    %97 = arith.negf %96 : vector<2x32xf32>
    %98 = math.exp %97 : vector<2x32xf32>
    %cst_59 = arith.constant 1.000000e+00 : f32
    %99 = vector.broadcast %cst_59 : f32 to vector<2x32xf32>
    %100 = arith.addf %99, %98 : vector<2x32xf32>
    %101 = arith.divf %99, %100 : vector<2x32xf32>
    %102 = vector.extract_strided_slice %84 {offsets = [0, 64], sizes = [2, 32], strides = [1, 1]} : vector<2x96xf32> to vector<2x32xf32>
    %103 = vector.extract_strided_slice %85 {offsets = [0, 64], sizes = [2, 32], strides = [1, 1]} : vector<2x96xf32> to vector<2x32xf32>
    %104 = vector.broadcast %82 : vector<1x32xf32> to vector<2x32xf32>
    %105 = arith.addf %103, %104 : vector<2x32xf32>
    %106 = arith.mulf %93, %105 : vector<2x32xf32>
    %107 = arith.addf %102, %106 : vector<2x32xf32>
    %108 = math.tanh %107 : vector<2x32xf32>
    %cst_60 = arith.constant 1.000000e+00 : f32
    %109 = vector.broadcast %cst_60 : f32 to vector<2x32xf32>
    %110 = arith.subf %109, %101 : vector<2x32xf32>
    %111 = arith.mulf %110, %108 : vector<2x32xf32>
    %112 = arith.mulf %101, %83 : vector<2x32xf32>
    %113 = arith.addf %111, %112 : vector<2x32xf32>
    %114 = vector.extract_strided_slice %80 {offsets = [2, 0], sizes = [2, 96], strides = [1, 1]} : vector<16x96xf32> to vector<2x96xf32>
    %cst_61 = arith.constant dense<0.000000e+00> : vector<2x96xf32>
    %115 = tpu.matmul %113, %81, %cst_61 {dimension_numbers = #tpu.dot_dimension_numbers<[1], [0], [0], [1], [0, 0, 1, 1], [], []>} : vector<2x32xf32>, vector<32x96xf32>, vector<2x96xf32> -> vector<2x96xf32>
    %116 = vector.extract_strided_slice %114 {offsets = [0, 0], sizes = [2, 32], strides = [1, 1]} : vector<2x96xf32> to vector<2x32xf32>
    %117 = vector.extract_strided_slice %115 {offsets = [0, 0], sizes = [2, 32], strides = [1, 1]} : vector<2x96xf32> to vector<2x32xf32>
    %118 = arith.addf %116, %117 : vector<2x32xf32>
    %119 = arith.negf %118 : vector<2x32xf32>
    %120 = math.exp %119 : vector<2x32xf32>
    %cst_62 = arith.constant 1.000000e+00 : f32
    %121 = vector.broadcast %cst_62 : f32 to vector<2x32xf32>
    %122 = arith.addf %121, %120 : vector<2x32xf32>
    %123 = arith.divf %121, %122 : vector<2x32xf32>
    %124 = vector.extract_strided_slice %114 {offsets = [0, 32], sizes = [2, 32], strides = [1, 1]} : vector<2x96xf32> to vector<2x32xf32>
    %125 = vector.extract_strided_slice %115 {offsets = [0, 32], sizes = [2, 32], strides = [1, 1]} : vector<2x96xf32> to vector<2x32xf32>
    %126 = arith.addf %124, %125 : vector<2x32xf32>
    %127 = arith.negf %126 : vector<2x32xf32>
    %128 = math.exp %127 : vector<2x32xf32>
    %cst_63 = arith.constant 1.000000e+00 : f32
    %129 = vector.broadcast %cst_63 : f32 to vector<2x32xf32>
    %130 = arith.addf %129, %128 : vector<2x32xf32>
    %131 = arith.divf %129, %130 : vector<2x32xf32>
    %132 = vector.extract_strided_slice %114 {offsets = [0, 64], sizes = [2, 32], strides = [1, 1]} : vector<2x96xf32> to vector<2x32xf32>
    %133 = vector.extract_strided_slice %115 {offsets = [0, 64], sizes = [2, 32], strides = [1, 1]} : vector<2x96xf32> to vector<2x32xf32>
    %134 = vector.broadcast %82 : vector<1x32xf32> to vector<2x32xf32>
    %135 = arith.addf %133, %134 : vector<2x32xf32>
    %136 = arith.mulf %123, %135 : vector<2x32xf32>
    %137 = arith.addf %132, %136 : vector<2x32xf32>
    %138 = math.tanh %137 : vector<2x32xf32>
    %cst_64 = arith.constant 1.000000e+00 : f32
    %139 = vector.broadcast %cst_64 : f32 to vector<2x32xf32>
    %140 = arith.subf %139, %131 : vector<2x32xf32>
    %141 = arith.mulf %140, %138 : vector<2x32xf32>
    %142 = arith.mulf %131, %113 : vector<2x32xf32>
    %143 = arith.addf %141, %142 : vector<2x32xf32>
    %144 = vector.extract_strided_slice %80 {offsets = [4, 0], sizes = [2, 96], strides = [1, 1]} : vector<16x96xf32> to vector<2x96xf32>
    %cst_65 = arith.constant dense<0.000000e+00> : vector<2x96xf32>
    %145 = tpu.matmul %143, %81, %cst_65 {dimension_numbers = #tpu.dot_dimension_numbers<[1], [0], [0], [1], [0, 0, 1, 1], [], []>} : vector<2x32xf32>, vector<32x96xf32>, vector<2x96xf32> -> vector<2x96xf32>
    %146 = vector.extract_strided_slice %144 {offsets = [0, 0], sizes = [2, 32], strides = [1, 1]} : vector<2x96xf32> to vector<2x32xf32>
    %147 = vector.extract_strided_slice %145 {offsets = [0, 0], sizes = [2, 32], strides = [1, 1]} : vector<2x96xf32> to vector<2x32xf32>
    %148 = arith.addf %146, %147 : vector<2x32xf32>
    %149 = arith.negf %148 : vector<2x32xf32>
    %150 = math.exp %149 : vector<2x32xf32>
    %cst_66 = arith.constant 1.000000e+00 : f32
    %151 = vector.broadcast %cst_66 : f32 to vector<2x32xf32>
    %152 = arith.addf %151, %150 : vector<2x32xf32>
    %153 = arith.divf %151, %152 : vector<2x32xf32>
    %154 = vector.extract_strided_slice %144 {offsets = [0, 32], sizes = [2, 32], strides = [1, 1]} : vector<2x96xf32> to vector<2x32xf32>
    %155 = vector.extract_strided_slice %145 {offsets = [0, 32], sizes = [2, 32], strides = [1, 1]} : vector<2x96xf32> to vector<2x32xf32>
    %156 = arith.addf %154, %155 : vector<2x32xf32>
    %157 = arith.negf %156 : vector<2x32xf32>
    %158 = math.exp %157 : vector<2x32xf32>
    %cst_67 = arith.constant 1.000000e+00 : f32
    %159 = vector.broadcast %cst_67 : f32 to vector<2x32xf32>
    %160 = arith.addf %159, %158 : vector<2x32xf32>
    %161 = arith.divf %159, %160 : vector<2x32xf32>
    %162 = vector.extract_strided_slice %144 {offsets = [0, 64], sizes = [2, 32], strides = [1, 1]} : vector<2x96xf32> to vector<2x32xf32>
    %163 = vector.extract_strided_slice %145 {offsets = [0, 64], sizes = [2, 32], strides = [1, 1]} : vector<2x96xf32> to vector<2x32xf32>
    %164 = vector.broadcast %82 : vector<1x32xf32> to vector<2x32xf32>
    %165 = arith.addf %163, %164 : vector<2x32xf32>
    %166 = arith.mulf %153, %165 : vector<2x32xf32>
    %167 = arith.addf %162, %166 : vector<2x32xf32>
    %168 = math.tanh %167 : vector<2x32xf32>
    %cst_68 = arith.constant 1.000000e+00 : f32
    %169 = vector.broadcast %cst_68 : f32 to vector<2x32xf32>
    %170 = arith.subf %169, %161 : vector<2x32xf32>
    %171 = arith.mulf %170, %168 : vector<2x32xf32>
    %172 = arith.mulf %161, %143 : vector<2x32xf32>
    %173 = arith.addf %171, %172 : vector<2x32xf32>
    %174 = vector.extract_strided_slice %80 {offsets = [6, 0], sizes = [2, 96], strides = [1, 1]} : vector<16x96xf32> to vector<2x96xf32>
    %cst_69 = arith.constant dense<0.000000e+00> : vector<2x96xf32>
    %175 = tpu.matmul %173, %81, %cst_69 {dimension_numbers = #tpu.dot_dimension_numbers<[1], [0], [0], [1], [0, 0, 1, 1], [], []>} : vector<2x32xf32>, vector<32x96xf32>, vector<2x96xf32> -> vector<2x96xf32>
    %176 = vector.extract_strided_slice %174 {offsets = [0, 0], sizes = [2, 32], strides = [1, 1]} : vector<2x96xf32> to vector<2x32xf32>
    %177 = vector.extract_strided_slice %175 {offsets = [0, 0], sizes = [2, 32], strides = [1, 1]} : vector<2x96xf32> to vector<2x32xf32>
    %178 = arith.addf %176, %177 : vector<2x32xf32>
    %179 = arith.negf %178 : vector<2x32xf32>
    %180 = math.exp %179 : vector<2x32xf32>
    %cst_70 = arith.constant 1.000000e+00 : f32
    %181 = vector.broadcast %cst_70 : f32 to vector<2x32xf32>
    %182 = arith.addf %181, %180 : vector<2x32xf32>
    %183 = arith.divf %181, %182 : vector<2x32xf32>
    %184 = vector.extract_strided_slice %174 {offsets = [0, 32], sizes = [2, 32], strides = [1, 1]} : vector<2x96xf32> to vector<2x32xf32>
    %185 = vector.extract_strided_slice %175 {offsets = [0, 32], sizes = [2, 32], strides = [1, 1]} : vector<2x96xf32> to vector<2x32xf32>
    %186 = arith.addf %184, %185 : vector<2x32xf32>
    %187 = arith.negf %186 : vector<2x32xf32>
    %188 = math.exp %187 : vector<2x32xf32>
    %cst_71 = arith.constant 1.000000e+00 : f32
    %189 = vector.broadcast %cst_71 : f32 to vector<2x32xf32>
    %190 = arith.addf %189, %188 : vector<2x32xf32>
    %191 = arith.divf %189, %190 : vector<2x32xf32>
    %192 = vector.extract_strided_slice %174 {offsets = [0, 64], sizes = [2, 32], strides = [1, 1]} : vector<2x96xf32> to vector<2x32xf32>
    %193 = vector.extract_strided_slice %175 {offsets = [0, 64], sizes = [2, 32], strides = [1, 1]} : vector<2x96xf32> to vector<2x32xf32>
    %194 = vector.broadcast %82 : vector<1x32xf32> to vector<2x32xf32>
    %195 = arith.addf %193, %194 : vector<2x32xf32>
    %196 = arith.mulf %183, %195 : vector<2x32xf32>
    %197 = arith.addf %192, %196 : vector<2x32xf32>
    %198 = math.tanh %197 : vector<2x32xf32>
    %cst_72 = arith.constant 1.000000e+00 : f32
    %199 = vector.broadcast %cst_72 : f32 to vector<2x32xf32>
    %200 = arith.subf %199, %191 : vector<2x32xf32>
    %201 = arith.mulf %200, %198 : vector<2x32xf32>
    %202 = arith.mulf %191, %173 : vector<2x32xf32>
    %203 = arith.addf %201, %202 : vector<2x32xf32>
    %204 = vector.extract_strided_slice %80 {offsets = [8, 0], sizes = [2, 96], strides = [1, 1]} : vector<16x96xf32> to vector<2x96xf32>
    %cst_73 = arith.constant dense<0.000000e+00> : vector<2x96xf32>
    %205 = tpu.matmul %203, %81, %cst_73 {dimension_numbers = #tpu.dot_dimension_numbers<[1], [0], [0], [1], [0, 0, 1, 1], [], []>} : vector<2x32xf32>, vector<32x96xf32>, vector<2x96xf32> -> vector<2x96xf32>
    %206 = vector.extract_strided_slice %204 {offsets = [0, 0], sizes = [2, 32], strides = [1, 1]} : vector<2x96xf32> to vector<2x32xf32>
    %207 = vector.extract_strided_slice %205 {offsets = [0, 0], sizes = [2, 32], strides = [1, 1]} : vector<2x96xf32> to vector<2x32xf32>
    %208 = arith.addf %206, %207 : vector<2x32xf32>
    %209 = arith.negf %208 : vector<2x32xf32>
    %210 = math.exp %209 : vector<2x32xf32>
    %cst_74 = arith.constant 1.000000e+00 : f32
    %211 = vector.broadcast %cst_74 : f32 to vector<2x32xf32>
    %212 = arith.addf %211, %210 : vector<2x32xf32>
    %213 = arith.divf %211, %212 : vector<2x32xf32>
    %214 = vector.extract_strided_slice %204 {offsets = [0, 32], sizes = [2, 32], strides = [1, 1]} : vector<2x96xf32> to vector<2x32xf32>
    %215 = vector.extract_strided_slice %205 {offsets = [0, 32], sizes = [2, 32], strides = [1, 1]} : vector<2x96xf32> to vector<2x32xf32>
    %216 = arith.addf %214, %215 : vector<2x32xf32>
    %217 = arith.negf %216 : vector<2x32xf32>
    %218 = math.exp %217 : vector<2x32xf32>
    %cst_75 = arith.constant 1.000000e+00 : f32
    %219 = vector.broadcast %cst_75 : f32 to vector<2x32xf32>
    %220 = arith.addf %219, %218 : vector<2x32xf32>
    %221 = arith.divf %219, %220 : vector<2x32xf32>
    %222 = vector.extract_strided_slice %204 {offsets = [0, 64], sizes = [2, 32], strides = [1, 1]} : vector<2x96xf32> to vector<2x32xf32>
    %223 = vector.extract_strided_slice %205 {offsets = [0, 64], sizes = [2, 32], strides = [1, 1]} : vector<2x96xf32> to vector<2x32xf32>
    %224 = vector.broadcast %82 : vector<1x32xf32> to vector<2x32xf32>
    %225 = arith.addf %223, %224 : vector<2x32xf32>
    %226 = arith.mulf %213, %225 : vector<2x32xf32>
    %227 = arith.addf %222, %226 : vector<2x32xf32>
    %228 = math.tanh %227 : vector<2x32xf32>
    %cst_76 = arith.constant 1.000000e+00 : f32
    %229 = vector.broadcast %cst_76 : f32 to vector<2x32xf32>
    %230 = arith.subf %229, %221 : vector<2x32xf32>
    %231 = arith.mulf %230, %228 : vector<2x32xf32>
    %232 = arith.mulf %221, %203 : vector<2x32xf32>
    %233 = arith.addf %231, %232 : vector<2x32xf32>
    %234 = vector.extract_strided_slice %80 {offsets = [10, 0], sizes = [2, 96], strides = [1, 1]} : vector<16x96xf32> to vector<2x96xf32>
    %cst_77 = arith.constant dense<0.000000e+00> : vector<2x96xf32>
    %235 = tpu.matmul %233, %81, %cst_77 {dimension_numbers = #tpu.dot_dimension_numbers<[1], [0], [0], [1], [0, 0, 1, 1], [], []>} : vector<2x32xf32>, vector<32x96xf32>, vector<2x96xf32> -> vector<2x96xf32>
    %236 = vector.extract_strided_slice %234 {offsets = [0, 0], sizes = [2, 32], strides = [1, 1]} : vector<2x96xf32> to vector<2x32xf32>
    %237 = vector.extract_strided_slice %235 {offsets = [0, 0], sizes = [2, 32], strides = [1, 1]} : vector<2x96xf32> to vector<2x32xf32>
    %238 = arith.addf %236, %237 : vector<2x32xf32>
    %239 = arith.negf %238 : vector<2x32xf32>
    %240 = math.exp %239 : vector<2x32xf32>
    %cst_78 = arith.constant 1.000000e+00 : f32
    %241 = vector.broadcast %cst_78 : f32 to vector<2x32xf32>
    %242 = arith.addf %241, %240 : vector<2x32xf32>
    %243 = arith.divf %241, %242 : vector<2x32xf32>
    %244 = vector.extract_strided_slice %234 {offsets = [0, 32], sizes = [2, 32], strides = [1, 1]} : vector<2x96xf32> to vector<2x32xf32>
    %245 = vector.extract_strided_slice %235 {offsets = [0, 32], sizes = [2, 32], strides = [1, 1]} : vector<2x96xf32> to vector<2x32xf32>
    %246 = arith.addf %244, %245 : vector<2x32xf32>
    %247 = arith.negf %246 : vector<2x32xf32>
    %248 = math.exp %247 : vector<2x32xf32>
    %cst_79 = arith.constant 1.000000e+00 : f32
    %249 = vector.broadcast %cst_79 : f32 to vector<2x32xf32>
    %250 = arith.addf %249, %248 : vector<2x32xf32>
    %251 = arith.divf %249, %250 : vector<2x32xf32>
    %252 = vector.extract_strided_slice %234 {offsets = [0, 64], sizes = [2, 32], strides = [1, 1]} : vector<2x96xf32> to vector<2x32xf32>
    %253 = vector.extract_strided_slice %235 {offsets = [0, 64], sizes = [2, 32], strides = [1, 1]} : vector<2x96xf32> to vector<2x32xf32>
    %254 = vector.broadcast %82 : vector<1x32xf32> to vector<2x32xf32>
    %255 = arith.addf %253, %254 : vector<2x32xf32>
    %256 = arith.mulf %243, %255 : vector<2x32xf32>
    %257 = arith.addf %252, %256 : vector<2x32xf32>
    %258 = math.tanh %257 : vector<2x32xf32>
    %cst_80 = arith.constant 1.000000e+00 : f32
    %259 = vector.broadcast %cst_80 : f32 to vector<2x32xf32>
    %260 = arith.subf %259, %251 : vector<2x32xf32>
    %261 = arith.mulf %260, %258 : vector<2x32xf32>
    %262 = arith.mulf %251, %233 : vector<2x32xf32>
    %263 = arith.addf %261, %262 : vector<2x32xf32>
    %264 = vector.extract_strided_slice %80 {offsets = [12, 0], sizes = [2, 96], strides = [1, 1]} : vector<16x96xf32> to vector<2x96xf32>
    %cst_81 = arith.constant dense<0.000000e+00> : vector<2x96xf32>
    %265 = tpu.matmul %263, %81, %cst_81 {dimension_numbers = #tpu.dot_dimension_numbers<[1], [0], [0], [1], [0, 0, 1, 1], [], []>} : vector<2x32xf32>, vector<32x96xf32>, vector<2x96xf32> -> vector<2x96xf32>
    %266 = vector.extract_strided_slice %264 {offsets = [0, 0], sizes = [2, 32], strides = [1, 1]} : vector<2x96xf32> to vector<2x32xf32>
    %267 = vector.extract_strided_slice %265 {offsets = [0, 0], sizes = [2, 32], strides = [1, 1]} : vector<2x96xf32> to vector<2x32xf32>
    %268 = arith.addf %266, %267 : vector<2x32xf32>
    %269 = arith.negf %268 : vector<2x32xf32>
    %270 = math.exp %269 : vector<2x32xf32>
    %cst_82 = arith.constant 1.000000e+00 : f32
    %271 = vector.broadcast %cst_82 : f32 to vector<2x32xf32>
    %272 = arith.addf %271, %270 : vector<2x32xf32>
    %273 = arith.divf %271, %272 : vector<2x32xf32>
    %274 = vector.extract_strided_slice %264 {offsets = [0, 32], sizes = [2, 32], strides = [1, 1]} : vector<2x96xf32> to vector<2x32xf32>
    %275 = vector.extract_strided_slice %265 {offsets = [0, 32], sizes = [2, 32], strides = [1, 1]} : vector<2x96xf32> to vector<2x32xf32>
    %276 = arith.addf %274, %275 : vector<2x32xf32>
    %277 = arith.negf %276 : vector<2x32xf32>
    %278 = math.exp %277 : vector<2x32xf32>
    %cst_83 = arith.constant 1.000000e+00 : f32
    %279 = vector.broadcast %cst_83 : f32 to vector<2x32xf32>
    %280 = arith.addf %279, %278 : vector<2x32xf32>
    %281 = arith.divf %279, %280 : vector<2x32xf32>
    %282 = vector.extract_strided_slice %264 {offsets = [0, 64], sizes = [2, 32], strides = [1, 1]} : vector<2x96xf32> to vector<2x32xf32>
    %283 = vector.extract_strided_slice %265 {offsets = [0, 64], sizes = [2, 32], strides = [1, 1]} : vector<2x96xf32> to vector<2x32xf32>
    %284 = vector.broadcast %82 : vector<1x32xf32> to vector<2x32xf32>
    %285 = arith.addf %283, %284 : vector<2x32xf32>
    %286 = arith.mulf %273, %285 : vector<2x32xf32>
    %287 = arith.addf %282, %286 : vector<2x32xf32>
    %288 = math.tanh %287 : vector<2x32xf32>
    %cst_84 = arith.constant 1.000000e+00 : f32
    %289 = vector.broadcast %cst_84 : f32 to vector<2x32xf32>
    %290 = arith.subf %289, %281 : vector<2x32xf32>
    %291 = arith.mulf %290, %288 : vector<2x32xf32>
    %292 = arith.mulf %281, %263 : vector<2x32xf32>
    %293 = arith.addf %291, %292 : vector<2x32xf32>
    %294 = vector.extract_strided_slice %80 {offsets = [14, 0], sizes = [2, 96], strides = [1, 1]} : vector<16x96xf32> to vector<2x96xf32>
    %cst_85 = arith.constant dense<0.000000e+00> : vector<2x96xf32>
    %295 = tpu.matmul %293, %81, %cst_85 {dimension_numbers = #tpu.dot_dimension_numbers<[1], [0], [0], [1], [0, 0, 1, 1], [], []>} : vector<2x32xf32>, vector<32x96xf32>, vector<2x96xf32> -> vector<2x96xf32>
    %296 = vector.extract_strided_slice %294 {offsets = [0, 0], sizes = [2, 32], strides = [1, 1]} : vector<2x96xf32> to vector<2x32xf32>
    %297 = vector.extract_strided_slice %295 {offsets = [0, 0], sizes = [2, 32], strides = [1, 1]} : vector<2x96xf32> to vector<2x32xf32>
    %298 = arith.addf %296, %297 : vector<2x32xf32>
    %299 = arith.negf %298 : vector<2x32xf32>
    %300 = math.exp %299 : vector<2x32xf32>
    %cst_86 = arith.constant 1.000000e+00 : f32
    %301 = vector.broadcast %cst_86 : f32 to vector<2x32xf32>
    %302 = arith.addf %301, %300 : vector<2x32xf32>
    %303 = arith.divf %301, %302 : vector<2x32xf32>
    %304 = vector.extract_strided_slice %294 {offsets = [0, 32], sizes = [2, 32], strides = [1, 1]} : vector<2x96xf32> to vector<2x32xf32>
    %305 = vector.extract_strided_slice %295 {offsets = [0, 32], sizes = [2, 32], strides = [1, 1]} : vector<2x96xf32> to vector<2x32xf32>
    %306 = arith.addf %304, %305 : vector<2x32xf32>
    %307 = arith.negf %306 : vector<2x32xf32>
    %308 = math.exp %307 : vector<2x32xf32>
    %cst_87 = arith.constant 1.000000e+00 : f32
    %309 = vector.broadcast %cst_87 : f32 to vector<2x32xf32>
    %310 = arith.addf %309, %308 : vector<2x32xf32>
    %311 = arith.divf %309, %310 : vector<2x32xf32>
    %312 = vector.extract_strided_slice %294 {offsets = [0, 64], sizes = [2, 32], strides = [1, 1]} : vector<2x96xf32> to vector<2x32xf32>
    %313 = vector.extract_strided_slice %295 {offsets = [0, 64], sizes = [2, 32], strides = [1, 1]} : vector<2x96xf32> to vector<2x32xf32>
    %314 = vector.broadcast %82 : vector<1x32xf32> to vector<2x32xf32>
    %315 = arith.addf %313, %314 : vector<2x32xf32>
    %316 = arith.mulf %303, %315 : vector<2x32xf32>
    %317 = arith.addf %312, %316 : vector<2x32xf32>
    %318 = math.tanh %317 : vector<2x32xf32>
    %cst_88 = arith.constant 1.000000e+00 : f32
    %319 = vector.broadcast %cst_88 : f32 to vector<2x32xf32>
    %320 = arith.subf %319, %311 : vector<2x32xf32>
    %321 = arith.mulf %320, %318 : vector<2x32xf32>
    %322 = arith.mulf %311, %293 : vector<2x32xf32>
    %323 = arith.addf %321, %322 : vector<2x32xf32>
    %c0_89 = arith.constant 0 : index
    %c0_90 = arith.constant 0 : index
    %324 = vector.load %arg12[%c0_89, %c0_90] : memref<32x1xf32, #tpu.memory_space<vmem>>, vector<32x1xf32>
    %cst_91 = arith.constant dense<0.000000e+00> : vector<2x1xf32>
    %325 = tpu.matmul %323, %324, %cst_91 {dimension_numbers = #tpu.dot_dimension_numbers<[1], [0], [0], [1], [0, 0, 1, 1], [], []>} : vector<2x32xf32>, vector<32x1xf32>, vector<2x1xf32> -> vector<2x1xf32>
    %c0_92 = arith.constant 0 : index
    %c0_93 = arith.constant 0 : index
    %326 = vector.load %arg13[%c0_92, %c0_93] : memref<1x1xf32, #tpu.memory_space<vmem>>, vector<1x1xf32>
    %327 = vector.broadcast %326 : vector<1x1xf32> to vector<2x1xf32>
    %328 = arith.addf %325, %327 : vector<2x1xf32>
    %c0_94 = arith.constant 0 : index
    %c0_95 = arith.constant 0 : index
    %329 = vector.load %arg14[%c0_94, %c0_95] : memref<2x1xf32, #tpu.memory_space<vmem>>, vector<2x1xf32>
    tpu.vector_store %arg14[%c0_94, %c0_95], %328 {strides = array<i32>} : memref<2x1xf32, #tpu.memory_space<vmem>>, vector<2x1xf32>,
    return
  }
}

</mosaic_0001>

<bundles_post_ra>
// kernel: gnn_gru_model.1
= control target key start
LH: loop header
LB: loop body
LE: loop exit
PB: predicated region body
PF: predicated region fallthrough
CT: control target
= control target key end

     0   :  { %vm226_vm0 = vcmask 1042432   ;;  %vm141_vm1 = vcmask 23552   ;;  %vm446_vm2 = vcmask 261120   ;;  %vm736_vm3 = vcmask 785408   ;;  %s4934_s23 = smov 64   ;;  %s6141_s2 = inlined_call_operand.vmem [shape: f32[3,32], index: 2, kind: input, shape index: {}]   ;;  %s6142_s0 = inlined_call_operand.vmem [shape: f32[224,3], index: 0, kind: input, shape index: {}]   ;;  %s6143_s4 = inlined_call_operand.vmem [shape: f32[32,32], index: 4, kind: input, shape index: {}]   ;;  %s6144_s3 = inlined_call_operand.vmem [shape: f32[1,32], index: 3, kind: input, shape index: {}]   ;;  %s6145_s1 = inlined_call_operand.vmem [shape: f32[224,224], index: 1, kind: input, shape index: {}]   ;;  %s6146_s5 = inlined_call_operand.vmem [shape: f32[1,32], index: 5, kind: input, shape index: {}]   ;;  %s6147_s6 = inlined_call_operand.vmem [shape: f32[32,32], index: 6, kind: input, shape index: {}]   ;;  %s6148_s7 = inlined_call_operand.vmem [shape: f32[1,32], index: 7, kind: input, shape index: {}]   ;;  %s6149_s8 = inlined_call_operand.vmem [shape: f32[448,96], index: 8, kind: input, shape index: {}]   ;;  %s6150_s10 = inlined_call_operand.vmem [shape: f32[32,96], index: 10, kind: input, shape index: {}]   ;;  %s6151_s11 = inlined_call_operand.vmem [shape: f32[1,32], index: 11, kind: input, shape index: {}]   ;;  %s6152_s9 = inlined_call_operand.vmem [shape: f32[1,96], index: 9, kind: input, shape index: {}]   ;;  %s6153_s12 = inlined_call_operand.vmem [shape: f32[32,1], index: 12, kind: input, shape index: {}]   ;;  %s6154_s13 = inlined_call_operand.<no memory space> [shape: f32[1,1], index: 13, kind: input, shape index: {}]   ;;  %s6155_s14 = inlined_call_operand.vmem [shape: f32[2,1], index: 14, kind: output, shape index: {}]  }
   0x1   :  { %v133_v0 = vld [vmem:[%s6141_s2] sm:$0x7]  ;;  %v106_v2 = vld [vmem:[%s6142_s0 + $0x8] sm:$0xff]  ;;  %v107_v3 = vld [vmem:[%s6142_s0 + $0x10] sm:$0xff]  ;;  %vm4932_vm4 = vmmov 0   ;;  %vm3768_vm5 = vcmask 1024  }
   0x2   :  { %v105_v1 = vld [vmem:[%s6142_s0] sm:$0xff]  ;;  %4187 = vmatprep.subr.msk.mxu0 %vm226_vm0, %v133_v0  ;;  %v108_v4 = vld [vmem:[%s6142_s0 + $0x18] sm:$0xff]  ;;  %v110_v6 = vld [vmem:[%s6142_s0 + $0x28] sm:$0xff] }
   0x3   :  { %4189 = vmatprep.mubr.msk.f32.mxu0 %vm141_vm1, %v105_v1  ;;  %4188 = vmatpush3.msk.msra.mxu0 %vm226_vm0, %v133_v0  ;;  %v109_v5 = vld [vmem:[%s6142_s0 + $0x20] sm:$0xff]  ;;  %v111_v7 = vld [vmem:[%s6142_s0 + $0x30] sm:$0xff]  ;;  %v436_v9 = vld [vmem:[%s6143_s4 + $0x8] sm:$0xff] }
   0x4   :  { %4190 = vmatmul.mubr.msk.f32.vlgmr.msra.gmra.mrb[0].mxu0 %vm141_vm1, %v106_v2  ;;  %v435_v8 = vld [vmem:[%s6143_s4] sm:$0xff]  ;;  %v112_v11 = vld [vmem:[%s6142_s0 + $0x38] sm:$0xff]  ;;  %v114_v13 = vld [vmem:[%s6142_s0 + $0x48] sm:$0xff] }
   0x5   :  { %4192 = vmatprep.mubr.msk.f32.mxu0 %vm141_vm1, %v107_v3  ;;  %v4584_v10 = vpack.c.bf16 %v436_v9, %v435_v8  ;;  %v113_v12 = vld [vmem:[%s6142_s0 + $0x40] sm:$0xff]  ;;  %v115_v14 = vld [vmem:[%s6142_s0 + $0x50] sm:$0xff]  ;;  %v116_v15 = vld [vmem:[%s6142_s0 + $0x58] sm:$0xff] }
   0x6   :  { %v117_v16 = vld [vmem:[%s6142_s0 + $0x60] sm:$0xff]  ;;  %v118_v17 = vld [vmem:[%s6142_s0 + $0x68] sm:$0xff]  ;;  %v119_v18 = vld [vmem:[%s6142_s0 + $0x70] sm:$0xff] }
   0x7   :  { %4585 = vmatprep.subr.bf16.mxu1 %v4584_v10  ;;  %v120_v19 = vld [vmem:[%s6142_s0 + $0x78] sm:$0xff]  ;;  %v121_v20 = vld [vmem:[%s6142_s0 + $0x80] sm:$0xff]  ;;  %v122_v21 = vld [vmem:[%s6142_s0 + $0x88] sm:$0xff] }
   0x8   :  { %4193 = vmatmul.mubr.msk.f32.gmra.mrb[2].mxu0 %vm141_vm1, %v108_v4  ;;  %4587 = vmatpush3.bf16.msra.mxu1 %v4584_v10  ;;  %v123_v22 = vld [vmem:[%s6142_s0 + $0x90] sm:$0xff]  ;;  %v124_v23 = vld [vmem:[%s6142_s0 + $0x98] sm:$0xff]  ;;  %v125_v24 = vld [vmem:[%s6142_s0 + $0xa0] sm:$0xff] }
   0x9   :  { %4195 = vmatprep.mubr.msk.f32.mxu0 %vm141_vm1, %v109_v5  ;;  %v126_v25 = vld [vmem:[%s6142_s0 + $0xa8] sm:$0xff]  ;;  %v127_v26 = vld [vmem:[%s6142_s0 + $0xb0] sm:$0xff]  ;;  %v128_v27 = vld [vmem:[%s6142_s0 + $0xb8] sm:$0xff] }
   0xa   :  { %v129_v28 = vld [vmem:[%s6142_s0 + $0xc0] sm:$0xff]  ;;  %v130_v29 = vld [vmem:[%s6142_s0 + $0xc8] sm:$0xff]  ;;  %v131_v30 = vld [vmem:[%s6142_s0 + $0xd0] sm:$0xff] }
   0xb   :  { %v132_v31 = vld [vmem:[%s6142_s0 + $0xd8] sm:$0xff]  ;;  %v437_v32 = vld [vmem:[%s6143_s4 + $0x10] sm:$0xff]  ;;  %v5141_v35 = vld [vmem:[%s6144_s3] ss:$0 sm:$0xff] }
   0xc   :  { %4196 = vmatmul.mubr.msk.f32.gmra.mrb[4].mxu0 %vm141_vm1, %v110_v6  ;;  %v438_v33 = vld [vmem:[%s6143_s4 + $0x18] sm:$0xff] }
   0xd   :  { %4198 = vmatprep.mubr.msk.f32.mxu0 %vm141_vm1, %v111_v7  ;;  %v4588_v34 = vpack.c.bf16 %v438_v33, %v437_v32 }
   0xf   :  { %4589 = vmatprep.subr.bf16.mxu1 %v4588_v34 }
  0x10   :  { %4199 = vmatmul.mubr.msk.f32.gmra.mrb[6].mxu0 %vm141_vm1, %v112_v11  ;;  %4591 = vmatpush3.bf16.msra.mxu1 %v4588_v34 }
  0x11   :  { %4201 = vmatprep.mubr.msk.f32.mxu0 %vm141_vm1, %v113_v12 }
  0x14   :  { %4202 = vmatmul.mubr.msk.f32.gmra.mrb[8].mxu0 %vm141_vm1, %v114_v13 }
  0x15   :  { %4204 = vmatprep.mubr.msk.f32.mxu0 %vm141_vm1, %v115_v14 }
  0x18   :  { %4205 = vmatmul.mubr.msk.f32.gmra.mrb[10].mxu0 %vm141_vm1, %v116_v15 }
  0x19   :  { %4207 = vmatprep.mubr.msk.f32.mxu0 %vm141_vm1, %v117_v16 }
  0x1c   :  { %4208 = vmatmul.mubr.msk.f32.gmra.mrb[12].mxu0 %vm141_vm1, %v118_v17 }
  0x1d   :  { %4210 = vmatprep.mubr.msk.f32.mxu0 %vm141_vm1, %v119_v18 }
  0x20   :  { %4211 = vmatmul.mubr.msk.f32.gmra.mrb[14].mxu0 %vm141_vm1, %v120_v19 }
  0x21   :  { %4213 = vmatprep.mubr.msk.f32.mxu0 %vm141_vm1, %v121_v20 }
  0x24   :  { %4214 = vmatmul.mubr.msk.f32.gmra.mrb[16].mxu0 %vm141_vm1, %v122_v21 }
  0x25   :  { %4216 = vmatprep.mubr.msk.f32.mxu0 %vm141_vm1, %v123_v22 }
  0x28   :  { %4217 = vmatmul.mubr.msk.f32.gmra.mrb[18].mxu0 %vm141_vm1, %v124_v23 }
  0x29   :  { %4219 = vmatprep.mubr.msk.f32.mxu0 %vm141_vm1, %v125_v24 }
  0x2c   :  { %4220 = vmatmul.mubr.msk.f32.gmra.mrb[20].mxu0 %vm141_vm1, %v126_v25 }
  0x2d   :  { %4222 = vmatprep.mubr.msk.f32.mxu0 %vm141_vm1, %v127_v26 }
  0x30   :  { %4223 = vmatmul.mubr.msk.f32.gmra.mrb[22].mxu0 %vm141_vm1, %v128_v27 }
  0x31   :  { %4225 = vmatprep.mubr.msk.f32.mxu0 %vm141_vm1, %v129_v28  ;;  %v6156_v28 = vmov 0.0|0.0  }
  0x32   :  { %4592 = vmatprep.subr.bf16.mxu0 %v6156_v28 }
  0x34   :  { %4226 = vmatmul.mubr.msk.f32.gmra.mrb[24].mxu0 %vm141_vm1, %v130_v29  ;;  %v5203_v29 = vld [vmem:[%s6145_s1 + $0x8] sm:$0xff] }
  0x35   :  { %4228 = vmatprep.mubr.msk.f32.mxu0 %vm141_vm1, %v131_v30  ;;  %v5210_v30 = vld [vmem:[%s6146_s5] ss:$0 sm:$0xff] }
  0x38   :  { %4229 = vmatmul.mubr.msk.f32.gmra.mrb[26].mxu0 %vm141_vm1, %v132_v31 }
  0x39   :  { %3833 = vmatprep.mubr.msk.f32.mxu0 %vm736_vm3, %v5203_v29 }
  0xd7   :  { %v4191_v36 = vpop.f32.mrb[0].mxu0 }
  0xd8   :  { %v296_v37 = vpop.f32.mrb[1].mxu0  ;;  %v302_v39 = vadd.f32 %v4191_v36, %v5141_v35 }
  0xd9   :  { %v297_v38 = vadd.f32 %v5141_v35, %v296_v37 }
  0xdb   :  { %v4194_v40 = vpop.f32.mrb[2].mxu0  ;;  %4239 = vmatprep.mubr.msk.f32.mxu1 %vm446_vm2, %v297_v38 }
  0xdc   :  { %v306_v41 = vpop.f32.mrb[3].mxu0  ;;  %4240 = vmatmul.mubr.msk.f32.vlgmr.msra.gmra.mrb[0].mxu1 %vm446_vm2, %v302_v39  ;;  %v312_v43 = vadd.f32 %v4194_v40, %v5141_v35 }
  0xdd   :  { %v307_v42 = vadd.f32 %v5141_v35, %v306_v41 }
  0xdf   :  { %v4197_v44 = vpop.f32.mrb[4].mxu0  ;;  %4242 = vmatprep.mubr.msk.f32.mxu1 %vm446_vm2, %v307_v42 }
  0xe0   :  { %v316_v45 = vpop.f32.mrb[5].mxu0  ;;  %4243 = vmatmul.mubr.msk.f32.gmra.mrb[2].mxu1 %vm446_vm2, %v312_v43  ;;  %v322_v47 = vadd.f32 %v4197_v44, %v5141_v35 }
  0xe1   :  { %v317_v46 = vadd.f32 %v5141_v35, %v316_v45 }
  0xe3   :  { %v4200_v48 = vpop.f32.mrb[6].mxu0  ;;  %4245 = vmatprep.mubr.msk.f32.mxu1 %vm446_vm2, %v317_v46 }
  0xe4   :  { %v326_v49 = vpop.f32.mrb[7].mxu0  ;;  %4246 = vmatmul.mubr.msk.f32.gmra.mrb[4].mxu1 %vm446_vm2, %v322_v47  ;;  %v332_v51 = vadd.f32 %v4200_v48, %v5141_v35 }
  0xe5   :  { %v327_v50 = vadd.f32 %v5141_v35, %v326_v49 }
  0xe7   :  { %v4203_v52 = vpop.f32.mrb[8].mxu0  ;;  %4248 = vmatprep.mubr.msk.f32.mxu1 %vm446_vm2, %v327_v50 }
  0xe8   :  { %v336_v53 = vpop.f32.mrb[9].mxu0  ;;  %4249 = vmatmul.mubr.msk.f32.gmra.mrb[6].mxu1 %vm446_vm2, %v332_v51  ;;  %v342_v55 = vadd.f32 %v4203_v52, %v5141_v35 }
  0xe9   :  { %v337_v54 = vadd.f32 %v5141_v35, %v336_v53 }
  0xeb   :  { %v4206_v56 = vpop.f32.mrb[10].mxu0  ;;  %4251 = vmatprep.mubr.msk.f32.mxu1 %vm446_vm2, %v337_v54 }
  0xec   :  { %v346_v57 = vpop.f32.mrb[11].mxu0  ;;  %4252 = vmatmul.mubr.msk.f32.gmra.mrb[8].mxu1 %vm446_vm2, %v342_v55  ;;  %v352_v59 = vadd.f32 %v4206_v56, %v5141_v35 }
  0xed   :  { %v347_v58 = vadd.f32 %v5141_v35, %v346_v57 }
  0xef   :  { %v4209_v60 = vpop.f32.mrb[12].mxu0  ;;  %4254 = vmatprep.mubr.msk.f32.mxu1 %vm446_vm2, %v347_v58 }
  0xf0   :  { %v356_v61 = vpop.f32.mrb[13].mxu0  ;;  %4255 = vmatmul.mubr.msk.f32.gmra.mrb[10].mxu1 %vm446_vm2, %v352_v59  ;;  %v362_v63 = vadd.f32 %v4209_v60, %v5141_v35 }
  0xf1   :  { %v357_v62 = vadd.f32 %v5141_v35, %v356_v61 }
  0xf3   :  { %v4212_v0 = vpop.f32.mrb[14].mxu0  ;;  %4257 = vmatprep.mubr.msk.f32.mxu1 %vm446_vm2, %v357_v62 }
  0xf4   :  { %v366_v1 = vpop.f32.mrb[15].mxu0  ;;  %4258 = vmatmul.mubr.msk.f32.gmra.mrb[12].mxu1 %vm446_vm2, %v362_v63  ;;  %v372_v3 = vadd.f32 %v4212_v0, %v5141_v35 }
  0xf5   :  { %v367_v2 = vadd.f32 %v5141_v35, %v366_v1 }
  0xf7   :  { %v4215_v4 = vpop.f32.mrb[16].mxu0  ;;  %4260 = vmatprep.mubr.msk.f32.mxu1 %vm446_vm2, %v367_v2 }
  0xf8   :  { %v376_v5 = vpop.f32.mrb[17].mxu0  ;;  %4261 = vmatmul.mubr.msk.f32.gmra.mrb[14].mxu1 %vm446_vm2, %v372_v3  ;;  %v382_v7 = vadd.f32 %v4215_v4, %v5141_v35 }
  0xf9   :  { %v377_v6 = vadd.f32 %v5141_v35, %v376_v5 }
  0xfb   :  { %v4218_v8 = vpop.f32.mrb[18].mxu0  ;;  %4263 = vmatprep.mubr.msk.f32.mxu1 %vm446_vm2, %v377_v6 }
  0xfc   :  { %v386_v9 = vpop.f32.mrb[19].mxu0  ;;  %4264 = vmatmul.mubr.msk.f32.gmra.mrb[16].mxu1 %vm446_vm2, %v382_v7  ;;  %v392_v11 = vadd.f32 %v4218_v8, %v5141_v35 }
  0xfd   :  { %v387_v10 = vadd.f32 %v5141_v35, %v386_v9 }
  0xff   :  { %v4221_v12 = vpop.f32.mrb[20].mxu0  ;;  %4266 = vmatprep.mubr.msk.f32.mxu1 %vm446_vm2, %v387_v10 }
 0x100   :  { %v396_v13 = vpop.f32.mrb[21].mxu0  ;;  %4267 = vmatmul.mubr.msk.f32.gmra.mrb[18].mxu1 %vm446_vm2, %v392_v11  ;;  %v402_v15 = vadd.f32 %v4221_v12, %v5141_v35 }
 0x101   :  { %v397_v14 = vadd.f32 %v5141_v35, %v396_v13 }
 0x103   :  { %v4224_v16 = vpop.f32.mrb[22].mxu0  ;;  %4269 = vmatprep.mubr.msk.f32.mxu1 %vm446_vm2, %v397_v14 }
 0x104   :  { %v406_v17 = vpop.f32.mrb[23].mxu0  ;;  %4270 = vmatmul.mubr.msk.f32.gmra.mrb[20].mxu1 %vm446_vm2, %v402_v15  ;;  %v412_v19 = vadd.f32 %v4224_v16, %v5141_v35 }
 0x105   :  { %v407_v18 = vadd.f32 %v5141_v35, %v406_v17 }
 0x107   :  { %v4227_v20 = vpop.f32.mrb[24].mxu0  ;;  %4272 = vmatprep.mubr.msk.f32.mxu1 %vm446_vm2, %v407_v18 }
 0x108   :  { %v416_v21 = vpop.f32.mrb[25].mxu0  ;;  %4273 = vmatmul.mubr.msk.f32.gmra.mrb[22].mxu1 %vm446_vm2, %v412_v19  ;;  %v422_v23 = vadd.f32 %v4227_v20, %v5141_v35 }
 0x109   :  { %v417_v22 = vadd.f32 %v5141_v35, %v416_v21  ;;  %v1054_v21 = vld [vmem:[%s6147_s6] sm:$0xff] }
 0x10b   :  { %v4230_v24 = vpop.f32.mrb[26].mxu0  ;;  %4275 = vmatprep.mubr.msk.f32.mxu1 %vm446_vm2, %v417_v22  ;;  %v1055_v22 = vld [vmem:[%s6147_s6 + $0x8] sm:$0xff] }
 0x10c   :  { %v426_v25 = vpop.f32.mrb[27].mxu0  ;;  %4276 = vmatmul.mubr.msk.f32.gmra.mrb[24].mxu1 %vm446_vm2, %v422_v23  ;;  %v432_v27 = vadd.f32 %v4230_v24, %v5141_v35  ;;  %v4634_v23 = vpack.c.bf16 %v1055_v22, %v1054_v21  ;;  %v5540_v21 = vld [vmem:[%s6145_s1 + $0x168] sm:$0xff]  ;;  %v1056_v22 = vld [vmem:[%s6147_s6 + $0x10] sm:$0xff] }
 0x10d   :  { %v427_v26 = vadd.f32 %v5141_v35, %v426_v25 }
 0x10e   :  { %4635 = vmatprep.subr.bf16.mxu1 %v4634_v23 }
 0x10f   :  { %4278 = vmatprep.mubr.msk.f32.mxu1 %vm446_vm2, %v427_v26  ;;  %4637 = vmatpush3.bf16.msra.mxu1 %v4634_v23  ;;  %v1057_v23 = vld [vmem:[%s6147_s6 + $0x18] sm:$0xff] }
 0x110   :  { %4279 = vmatmul.mubr.msk.f32.gmra.mrb[26].mxu1 %vm446_vm2, %v432_v27 }
 0x1af   :  { %v4241_v31 = vpop.f32.mrb[0].mxu1 }
 0x1b0   :  { %v603_v32 = vadd.f32 %v4241_v31, %v5210_v30  ;;  %v597_v33 = vpop.f32.mrb[1].mxu1 }
 0x1b1   :  { %v598_v34 = vadd.f32 %v5210_v30, %v597_v33 }
 0x1b3   :  { %v4593_v35 = vpack.c.bf16 %v603_v32, %v598_v34  ;;  %v4244_v36 = vpop.f32.mrb[2].mxu1 }
 0x1b4   :  { %v613_v37 = vadd.f32 %v4244_v36, %v5210_v30  ;;  %v607_v38 = vpop.f32.mrb[3].mxu1 }
 0x1b5   :  { %v608_v39 = vadd.f32 %v5210_v30, %v607_v38  ;;  %4594 = vmatpush1.bf16.msra.mxu0 %v4593_v35 }
 0x1b6   :  { %4595 = vmatprep.subr.bf16.mxu0 %v6156_v28 }
 0x1b7   :  { %v4596_v40 = vpack.c.bf16 %v613_v37, %v608_v39  ;;  %v4247_v41 = vpop.f32.mrb[4].mxu1 }
 0x1b8   :  { %v623_v42 = vadd.f32 %v4247_v41, %v5210_v30  ;;  %v617_v43 = vpop.f32.mrb[5].mxu1 }
 0x1b9   :  { %v618_v44 = vadd.f32 %v5210_v30, %v617_v43  ;;  %4597 = vmatpush1.bf16.msra.mxu0 %v4596_v40  ;;  %v5262_v43 = vld [vmem:[%s6145_s1] sm:$0xff] }
 0x1ba   :  { %4598 = vmatprep.subr.bf16.mxu0 %v6156_v28 }
 0x1bb   :  { %v4599_v45 = vpack.c.bf16 %v623_v42, %v618_v44  ;;  %v4250_v46 = vpop.f32.mrb[6].mxu1  ;;  %v5267_v44 = vld [vmem:[%s6145_s1 + $0x18] sm:$0xff] }
 0x1bc   :  { %v633_v47 = vadd.f32 %v4250_v46, %v5210_v30  ;;  %v627_v48 = vpop.f32.mrb[7].mxu1  ;;  %v5288_v46 = vld [vmem:[%s6145_s1 + $0x20] sm:$0xff] }
 0x1bd   :  { %v628_v49 = vadd.f32 %v5210_v30, %v627_v48  ;;  %4600 = vmatpush1.bf16.msra.mxu0 %v4599_v45  ;;  %v5280_v45 = vld [vmem:[%s6145_s1 + $0x28] sm:$0xff]  ;;  %v5301_v48 = vld [vmem:[%s6145_s1 + $0x30] sm:$0xff] }
 0x1be   :  { %4601 = vmatprep.subr.bf16.mxu0 %v6156_v28 }
 0x1bf   :  { %v4602_v50 = vpack.c.bf16 %v633_v47, %v628_v49  ;;  %v4253_v51 = vpop.f32.mrb[8].mxu1  ;;  %v5293_v47 = vld [vmem:[%s6145_s1 + $0x38] sm:$0xff]  ;;  %v5306_v49 = vld [vmem:[%s6145_s1 + $0x48] sm:$0xff] }
 0x1c0   :  { %v643_v52 = vadd.f32 %v4253_v51, %v5210_v30  ;;  %v637_v53 = vpop.f32.mrb[9].mxu1  ;;  %v5319_v51 = vld [vmem:[%s6145_s1 + $0x58] sm:$0xff] }
 0x1c1   :  { %v638_v54 = vadd.f32 %v5210_v30, %v637_v53  ;;  %4603 = vmatpush1.bf16.msra.mxu0 %v4602_v50  ;;  %v5314_v50 = vld [vmem:[%s6145_s1 + $0x40] sm:$0xff]  ;;  %v5332_v53 = vld [vmem:[%s6145_s1 + $0x68] sm:$0xff] }
 0x1c2   :  { %4604 = vmatprep.subr.bf16.mxu0 %v6156_v28 }
 0x1c3   :  { %v4605_v55 = vpack.c.bf16 %v643_v52, %v638_v54  ;;  %v4256_v56 = vpop.f32.mrb[10].mxu1  ;;  %v5327_v52 = vld [vmem:[%s6145_s1 + $0x50] sm:$0xff]  ;;  %v5340_v54 = vld [vmem:[%s6145_s1 + $0x60] sm:$0xff] }
 0x1c4   :  { %v653_v57 = vadd.f32 %v4256_v56, %v5210_v30  ;;  %v647_v58 = vpop.f32.mrb[11].mxu1  ;;  %v5353_v56 = vld [vmem:[%s6145_s1 + $0x70] sm:$0xff] }
 0x1c5   :  { %v648_v59 = vadd.f32 %v5210_v30, %v647_v58  ;;  %4606 = vmatpush1.bf16.msra.mxu0 %v4605_v55  ;;  %v5345_v55 = vld [vmem:[%s6145_s1 + $0x78] sm:$0xff]  ;;  %v5366_v58 = vld [vmem:[%s6145_s1 + $0x80] sm:$0xff] }
 0x1c6   :  { %4607 = vmatprep.subr.bf16.mxu0 %v6156_v28 }
 0x1c7   :  { %v4608_v60 = vpack.c.bf16 %v653_v57, %v648_v59  ;;  %v4259_v61 = vpop.f32.mrb[12].mxu1  ;;  %v5358_v57 = vld [vmem:[%s6145_s1 + $0x88] sm:$0xff]  ;;  %v5371_v59 = vld [vmem:[%s6145_s1 + $0x98] sm:$0xff] }
 0x1c8   :  { %v663_v62 = vadd.f32 %v4259_v61, %v5210_v30  ;;  %v657_v63 = vpop.f32.mrb[13].mxu1  ;;  %v5384_v61 = vld [vmem:[%s6145_s1 + $0xa8] sm:$0xff] }
 0x1c9   :  { %v658_v0 = vadd.f32 %v5210_v30, %v657_v63  ;;  %4609 = vmatpush1.bf16.msra.mxu0 %v4608_v60  ;;  %v5379_v60 = vld [vmem:[%s6145_s1 + $0x90] sm:$0xff]  ;;  %v5397_v63 = vld [vmem:[%s6145_s1 + $0xb8] sm:$0xff] }
 0x1ca   :  { %4610 = vmatprep.subr.bf16.mxu0 %v6156_v28 }
 0x1cb   :  { %v4611_v1 = vpack.c.bf16 %v663_v62, %v658_v0  ;;  %v4262_v2 = vpop.f32.mrb[14].mxu1  ;;  %v5392_v62 = vld [vmem:[%s6145_s1 + $0xa0] sm:$0xff]  ;;  %v5405_v0 = vld [vmem:[%s6145_s1 + $0xb0] sm:$0xff] }
 0x1cc   :  { %v673_v3 = vadd.f32 %v4262_v2, %v5210_v30  ;;  %v667_v4 = vpop.f32.mrb[15].mxu1  ;;  %v5418_v2 = vld [vmem:[%s6145_s1 + $0xc0] sm:$0xff] }
 0x1cd   :  { %v668_v5 = vadd.f32 %v5210_v30, %v667_v4  ;;  %4612 = vmatpush1.bf16.msra.mxu0 %v4611_v1  ;;  %v5410_v1 = vld [vmem:[%s6145_s1 + $0xc8] sm:$0xff]  ;;  %v5431_v4 = vld [vmem:[%s6145_s1 + $0xd0] sm:$0xff] }
 0x1ce   :  { %4613 = vmatprep.subr.bf16.mxu0 %v6156_v28 }
 0x1cf   :  { %v4614_v6 = vpack.c.bf16 %v673_v3, %v668_v5  ;;  %v4265_v7 = vpop.f32.mrb[16].mxu1  ;;  %v5423_v3 = vld [vmem:[%s6145_s1 + $0xd8] sm:$0xff]  ;;  %v5436_v5 = vld [vmem:[%s6145_s1 + $0xe8] sm:$0xff] }
 0x1d0   :  { %v683_v8 = vadd.f32 %v4265_v7, %v5210_v30  ;;  %v677_v9 = vpop.f32.mrb[17].mxu1  ;;  %v5449_v7 = vld [vmem:[%s6145_s1 + $0xf8] sm:$0xff] }
 0x1d1   :  { %v678_v10 = vadd.f32 %v5210_v30, %v677_v9  ;;  %4615 = vmatpush1.bf16.msra.mxu0 %v4614_v6  ;;  %v5444_v6 = vld [vmem:[%s6145_s1 + $0xe0] sm:$0xff]  ;;  %v5462_v9 = vld [vmem:[%s6145_s1 + $0x108] sm:$0xff] }
 0x1d2   :  { %4616 = vmatprep.subr.bf16.mxu0 %v6156_v28 }
 0x1d3   :  { %v4617_v11 = vpack.c.bf16 %v683_v8, %v678_v10  ;;  %v4268_v12 = vpop.f32.mrb[18].mxu1  ;;  %v5457_v8 = vld [vmem:[%s6145_s1 + $0xf0] sm:$0xff]  ;;  %v5470_v10 = vld [vmem:[%s6145_s1 + $0x100] sm:$0xff] }
 0x1d4   :  { %v693_v13 = vadd.f32 %v4268_v12, %v5210_v30  ;;  %v687_v14 = vpop.f32.mrb[19].mxu1  ;;  %v5483_v12 = vld [vmem:[%s6145_s1 + $0x110] sm:$0xff] }
 0x1d5   :  { %v688_v15 = vadd.f32 %v5210_v30, %v687_v14  ;;  %4618 = vmatpush1.bf16.msra.mxu0 %v4617_v11  ;;  %v5475_v11 = vld [vmem:[%s6145_s1 + $0x118] sm:$0xff]  ;;  %v5496_v14 = vld [vmem:[%s6145_s1 + $0x120] sm:$0xff] }
 0x1d6   :  { %4619 = vmatprep.subr.bf16.mxu0 %v6156_v28 }
 0x1d7   :  { %v4620_v16 = vpack.c.bf16 %v693_v13, %v688_v15  ;;  %v4271_v17 = vpop.f32.mrb[20].mxu1  ;;  %v5488_v13 = vld [vmem:[%s6145_s1 + $0x128] sm:$0xff]  ;;  %v5501_v15 = vld [vmem:[%s6145_s1 + $0x138] sm:$0xff] }
 0x1d8   :  { %v703_v18 = vadd.f32 %v4271_v17, %v5210_v30  ;;  %v697_v19 = vpop.f32.mrb[21].mxu1  ;;  %v5514_v17 = vld [vmem:[%s6145_s1 + $0x148] sm:$0xff] }
 0x1d9   :  { %v698_v20 = vadd.f32 %v5210_v30, %v697_v19  ;;  %4621 = vmatpush1.bf16.msra.mxu0 %v4620_v16  ;;  %v5509_v16 = vld [vmem:[%s6145_s1 + $0x130] sm:$0xff]  ;;  %v5527_v19 = vld [vmem:[%s6145_s1 + $0x158] sm:$0xff] }
 0x1da   :  { %4622 = vmatprep.subr.bf16.mxu0 %v6156_v28 }
 0x1db   :  { %v4623_v24 = vpack.c.bf16 %v703_v18, %v698_v20  ;;  %v4274_v25 = vpop.f32.mrb[22].mxu1  ;;  %v5522_v18 = vld [vmem:[%s6145_s1 + $0x140] sm:$0xff]  ;;  %v5535_v20 = vld [vmem:[%s6145_s1 + $0x150] sm:$0xff] }
 0x1dc   :  { %v713_v26 = vadd.f32 %v4274_v25, %v5210_v30  ;;  %v707_v27 = vpop.f32.mrb[23].mxu1  ;;  %v5554_v25 = vld [vmem:[%s6145_s1 + $0x160] sm:$0xff] }
 0x1dd   :  { %v708_v31 = vadd.f32 %v5210_v30, %v707_v27  ;;  %4624 = vmatpush1.bf16.msra.mxu0 %v4623_v24  ;;  %v4638_v24 = vpack.c.bf16 %v1057_v23, %v1056_v22  ;;  %v5568_v27 = vld [vmem:[%s6145_s1 + $0x170] sm:$0xff] }
 0x1de   :  { %4625 = vmatprep.subr.bf16.mxu0 %v6156_v28 }
 0x1df   :  { %v4626_v32 = vpack.c.bf16 %v713_v26, %v708_v31  ;;  %v4277_v33 = vpop.f32.mrb[24].mxu1  ;;  %v5559_v26 = vld [vmem:[%s6145_s1 + $0x178] sm:$0xff]  ;;  %4639 = vmatprep.subr.bf16.mxu1 %v4638_v24  ;;  %v5573_v31 = vld [vmem:[%s6145_s1 + $0x188] sm:$0xff] }
 0x1e0   :  { %v723_v34 = vadd.f32 %v4277_v33, %v5210_v30  ;;  %v717_v35 = vpop.f32.mrb[25].mxu1  ;;  %4641 = vmatpush3.bf16.msra.mxu1 %v4638_v24  ;;  %v5586_v33 = vld [vmem:[%s6145_s1 + $0x198] sm:$0xff] }
 0x1e1   :  { %v718_v36 = vadd.f32 %v5210_v30, %v717_v35  ;;  %4627 = vmatpush1.bf16.msra.mxu0 %v4626_v32  ;;  %4642 = vmatprep.subr.bf16.mxu1 %v6156_v28  ;;  %v5581_v32 = vld [vmem:[%s6145_s1 + $0x180] sm:$0xff]  ;;  %v5599_v35 = vld [vmem:[%s6145_s1 + $0x1a8] sm:$0xff] }
 0x1e2   :  { %4628 = vmatprep.subr.bf16.mxu0 %v6156_v28  ;;  %6164 = vst [vmem:[#allocation4_spill] sm:$0xff] %v5599_v35 }
 0x1e3   :  { %v4629_v37 = vpack.c.bf16 %v723_v34, %v718_v36  ;;  %v4280_v38 = vpop.f32.mrb[26].mxu1  ;;  %v5594_v34 = vld [vmem:[%s6145_s1 + $0x190] sm:$0xff]  ;;  %v5607_v36 = vld [vmem:[%s6145_s1 + $0x1a0] sm:$0xff] }
 0x1e4   :  { %v733_v39 = vadd.f32 %v4280_v38, %v5210_v30  ;;  %v727_v40 = vpop.f32.mrb[27].mxu1  ;;  %6163 = vst [vmem:[#allocation3_spill] sm:$0xff] %v5594_v34  ;;  %6165 = vst [vmem:[#allocation5_spill] sm:$0xff] %v5607_v36  ;;  %v5620_v38 = vld [vmem:[%s6145_s1 + $0x1b0] sm:$0xff] }
 0x1e5   :  { %v728_v41 = vadd.f32 %v5210_v30, %v727_v40  ;;  %4630 = vmatpush1.bf16.msra.mxu0 %v4629_v37  ;;  %v5275_v30 = vld [vmem:[%s6145_s1 + $0x10] sm:$0xff]  ;;  %v5612_v37 = vld [vmem:[%s6145_s1 + $0x1b8] sm:$0xff]  ;;  %6167 = vst [vmem:[#allocation7_spill] sm:$0xff] %v5620_v38 }
 0x1e6   :  { %4631 = vmatprep.subr.bf16.mxu0 %v6156_v28  ;;  %6166 = vst [vmem:[#allocation6_spill] sm:$0xff] %v5612_v37 }
 0x1e7   :  { %v4632_v42 = vpack.c.bf16 %v733_v39, %v728_v41 }
 0x1e9   :  { %4633 = vmatpush1.bf16.msra.mxu0 %v4632_v42 }
 0x1ec   :  { %886 = vmatmul.mubr.f32.vlgmr.msra.gmra.mrb[28].mxu0 %v5262_v43 }
 0x1ed   :  { %3834 = vmatprep.mubr.msk.f32.mxu0 %vm736_vm3, %v5267_v44 }
 0x1f0   :  { %891 = vmatmul.mubr.f32.gmra.mrb[30].mxu0 %v5275_v30 }
 0x1f1   :  { %3835 = vmatprep.mubr.msk.f32.mxu0 %vm736_vm3, %v5280_v45 }
 0x1f4   :  { %896 = vmatmul.mubr.f32.gmra.mrb[32].mxu0 %v5288_v46 }
 0x1f5   :  { %3836 = vmatprep.mubr.msk.f32.mxu0 %vm736_vm3, %v5293_v47 }
 0x1f8   :  { %901 = vmatmul.mubr.f32.gmra.mrb[34].mxu0 %v5301_v48 }
 0x1f9   :  { %3837 = vmatprep.mubr.msk.f32.mxu0 %vm736_vm3, %v5306_v49 }
 0x1fc   :  { %906 = vmatmul.mubr.f32.gmra.mrb[36].mxu0 %v5314_v50 }
 0x1fd   :  { %3838 = vmatprep.mubr.msk.f32.mxu0 %vm736_vm3, %v5319_v51 }
 0x200   :  { %911 = vmatmul.mubr.f32.gmra.mrb[38].mxu0 %v5327_v52 }
 0x201   :  { %3839 = vmatprep.mubr.msk.f32.mxu0 %vm736_vm3, %v5332_v53 }
 0x204   :  { %916 = vmatmul.mubr.f32.gmra.mrb[40].mxu0 %v5340_v54 }
 0x205   :  { %3840 = vmatprep.mubr.msk.f32.mxu0 %vm736_vm3, %v5345_v55 }
 0x208   :  { %921 = vmatmul.mubr.f32.gmra.mrb[42].mxu0 %v5353_v56 }
 0x209   :  { %3841 = vmatprep.mubr.msk.f32.mxu0 %vm736_vm3, %v5358_v57 }
 0x20c   :  { %926 = vmatmul.mubr.f32.gmra.mrb[44].mxu0 %v5366_v58 }
 0x20d   :  { %3842 = vmatprep.mubr.msk.f32.mxu0 %vm736_vm3, %v5371_v59 }
 0x210   :  { %931 = vmatmul.mubr.f32.gmra.mrb[46].mxu0 %v5379_v60 }
 0x211   :  { %3843 = vmatprep.mubr.msk.f32.mxu0 %vm736_vm3, %v5384_v61 }
 0x214   :  { %936 = vmatmul.mubr.f32.gmra.mrb[48].mxu0 %v5392_v62 }
 0x215   :  { %3844 = vmatprep.mubr.msk.f32.mxu0 %vm736_vm3, %v5397_v63 }
 0x218   :  { %941 = vmatmul.mubr.f32.gmra.mrb[50].mxu0 %v5405_v0 }
 0x219   :  { %3845 = vmatprep.mubr.msk.f32.mxu0 %vm736_vm3, %v5410_v1 }
 0x21c   :  { %946 = vmatmul.mubr.f32.gmra.mrb[52].mxu0 %v5418_v2 }
 0x21d   :  { %3846 = vmatprep.mubr.msk.f32.mxu0 %vm736_vm3, %v5423_v3 }
 0x220   :  { %951 = vmatmul.mubr.f32.gmra.mrb[54].mxu0 %v5431_v4 }
 0x221   :  { %3847 = vmatprep.mubr.msk.f32.mxu0 %vm736_vm3, %v5436_v5 }
 0x224   :  { %956 = vmatmul.mubr.f32.gmra.mrb[56].mxu0 %v5444_v6 }
 0x225   :  { %3848 = vmatprep.mubr.msk.f32.mxu0 %vm736_vm3, %v5449_v7 }
 0x228   :  { %961 = vmatmul.mubr.f32.gmra.mrb[58].mxu0 %v5457_v8 }
 0x229   :  { %3849 = vmatprep.mubr.msk.f32.mxu0 %vm736_vm3, %v5462_v9 }
 0x22c   :  { %966 = vmatmul.mubr.f32.gmra.mrb[60].mxu0 %v5470_v10 }
 0x22d   :  { %3850 = vmatprep.mubr.msk.f32.mxu0 %vm736_vm3, %v5475_v11 }
 0x230   :  { %971 = vmatmul.mubr.f32.gmra.mrb[62].mxu0 %v5483_v12 }
 0x231   :  { %3851 = vmatprep.mubr.msk.f32.mxu0 %vm736_vm3, %v5488_v13 }
 0x234   :  { %976 = vmatmul.mubr.f32.gmra.mrb[64].mxu0 %v5496_v14 }
 0x235   :  { %3852 = vmatprep.mubr.msk.f32.mxu0 %vm736_vm3, %v5501_v15 }
 0x238   :  { %981 = vmatmul.mubr.f32.gmra.mrb[66].mxu0 %v5509_v16 }
 0x239   :  { %3853 = vmatprep.mubr.msk.f32.mxu0 %vm736_vm3, %v5514_v17 }
 0x23c   :  { %986 = vmatmul.mubr.f32.gmra.mrb[68].mxu0 %v5522_v18 }
 0x23d   :  { %3854 = vmatprep.mubr.msk.f32.mxu0 %vm736_vm3, %v5527_v19 }
 0x240   :  { %991 = vmatmul.mubr.f32.gmra.mrb[70].mxu0 %v5535_v20 }
 0x241   :  { %3855 = vmatprep.mubr.msk.f32.mxu0 %vm736_vm3, %v5540_v21 }
 0x244   :  { %996 = vmatmul.mubr.f32.gmra.mrb[72].mxu0 %v5554_v25 }
 0x245   :  { %3856 = vmatprep.mubr.msk.f32.mxu0 %vm736_vm3, %v5559_v26 }
 0x248   :  { %1001 = vmatmul.mubr.f32.gmra.mrb[74].mxu0 %v5568_v27 }
 0x249   :  { %3857 = vmatprep.mubr.msk.f32.mxu0 %vm736_vm3, %v5573_v31 }
 0x24c   :  { %1006 = vmatmul.mubr.f32.gmra.mrb[76].mxu0 %v5581_v32 }
 0x24d   :  { %3858 = vmatprep.mubr.msk.f32.mxu0 %vm736_vm3, %v5586_v33 }
 0x250   :  { %1011 = vmatmul.mubr.f32.gmra.mrb[78].mxu0 %v5594_v34 }
 0x251   :  { %3859 = vmatprep.mubr.msk.f32.mxu0 %vm736_vm3, %v5599_v35 }
 0x254   :  { %1016 = vmatmul.mubr.f32.gmra.mrb[80].mxu0 %v5607_v36 }
 0x255   :  { %3860 = vmatprep.mubr.msk.f32.mxu0 %vm736_vm3, %v5612_v37 }
 0x258   :  { %1021 = vmatmul.mubr.f32.gmra.mrb[82].mxu0 %v5620_v38 }
 0x2bf   :  { %v887_v39 = vpop.f32.mrb[28].mxu0 }
 0x2c0   :  { %v1026_v40 = vmax.f32 %v887_v39, 0.0  ;;  %v889_v41 = vpop.f32.mrb[29].mxu0 }
 0x2c2   :  { %4289 = vmatprep.mubr.msk.f32.mxu1 %vm446_vm2, %v1026_v40 }
 0x2c3   :  { %v892_v42 = vpop.f32.mrb[30].mxu0 }
 0x2c4   :  { %v1027_v22 = vmax.f32 %v892_v42, 0.0  ;;  %v894_v23 = vpop.f32.mrb[31].mxu0 }
 0x2c6   :  { %4290 = vmatmul.mubr.msk.f32.vlgmr.msra.gmra.mrb[28].mxu1 %vm446_vm2, %v1027_v22 }
 0x2c7   :  { %v897_v24 = vpop.f32.mrb[32].mxu0 }
 0x2c8   :  { %v1028_v28 = vmax.f32 %v897_v24, 0.0  ;;  %v899_v37 = vpop.f32.mrb[33].mxu0 }
 0x2ca   :  { %4292 = vmatprep.mubr.msk.f32.mxu1 %vm446_vm2, %v1028_v28 }
 0x2cb   :  { %v902_v36 = vpop.f32.mrb[34].mxu0 }
 0x2cc   :  { %v1029_v35 = vmax.f32 %v902_v36, 0.0  ;;  %v904_v34 = vpop.f32.mrb[35].mxu0 }
 0x2ce   :  { %4293 = vmatmul.mubr.msk.f32.gmra.mrb[30].mxu1 %vm446_vm2, %v1029_v35 }
 0x2cf   :  { %v907_v38 = vpop.f32.mrb[36].mxu0 }
 0x2d0   :  { %v1030_v39 = vmax.f32 %v907_v38, 0.0  ;;  %v909_v41 = vpop.f32.mrb[37].mxu0 }
 0x2d2   :  { %4295 = vmatprep.mubr.msk.f32.mxu1 %vm446_vm2, %v1030_v39 }
 0x2d3   :  { %v912_v40 = vpop.f32.mrb[38].mxu0 }
 0x2d4   :  { %v1031_v42 = vmax.f32 %v912_v40, 0.0  ;;  %v914_v23 = vpop.f32.mrb[39].mxu0 }
 0x2d6   :  { %4296 = vmatmul.mubr.msk.f32.gmra.mrb[32].mxu1 %vm446_vm2, %v1031_v42 }
 0x2d7   :  { %v917_v22 = vpop.f32.mrb[40].mxu0 }
 0x2d8   :  { %v1032_v24 = vmax.f32 %v917_v22, 0.0  ;;  %v919_v37 = vpop.f32.mrb[41].mxu0 }
 0x2da   :  { %4298 = vmatprep.mubr.msk.f32.mxu1 %vm446_vm2, %v1032_v24 }
 0x2db   :  { %v922_v28 = vpop.f32.mrb[42].mxu0 }
 0x2dc   :  { %v1033_v36 = vmax.f32 %v922_v28, 0.0  ;;  %v924_v34 = vpop.f32.mrb[43].mxu0 }
 0x2de   :  { %4299 = vmatmul.mubr.msk.f32.gmra.mrb[34].mxu1 %vm446_vm2, %v1033_v36 }
 0x2df   :  { %v927_v35 = vpop.f32.mrb[44].mxu0 }
 0x2e0   :  { %v1034_v38 = vmax.f32 %v927_v35, 0.0  ;;  %v929_v41 = vpop.f32.mrb[45].mxu0 }
 0x2e2   :  { %4301 = vmatprep.mubr.msk.f32.mxu1 %vm446_vm2, %v1034_v38 }
 0x2e3   :  { %v932_v39 = vpop.f32.mrb[46].mxu0 }
 0x2e4   :  { %v1035_v40 = vmax.f32 %v932_v39, 0.0  ;;  %v934_v23 = vpop.f32.mrb[47].mxu0 }
 0x2e6   :  { %4302 = vmatmul.mubr.msk.f32.gmra.mrb[36].mxu1 %vm446_vm2, %v1035_v40 }
 0x2e7   :  { %v937_v42 = vpop.f32.mrb[48].mxu0 }
 0x2e8   :  { %v1036_v22 = vmax.f32 %v937_v42, 0.0  ;;  %v939_v37 = vpop.f32.mrb[49].mxu0 }
 0x2ea   :  { %4304 = vmatprep.mubr.msk.f32.mxu1 %vm446_vm2, %v1036_v22 }
 0x2eb   :  { %v942_v24 = vpop.f32.mrb[50].mxu0 }
 0x2ec   :  { %v1037_v28 = vmax.f32 %v942_v24, 0.0  ;;  %v944_v34 = vpop.f32.mrb[51].mxu0 }
 0x2ee   :  { %4305 = vmatmul.mubr.msk.f32.gmra.mrb[38].mxu1 %vm446_vm2, %v1037_v28 }
 0x2ef   :  { %v947_v36 = vpop.f32.mrb[52].mxu0 }
 0x2f0   :  { %v1038_v35 = vmax.f32 %v947_v36, 0.0  ;;  %v949_v41 = vpop.f32.mrb[53].mxu0 }
 0x2f2   :  { %4307 = vmatprep.mubr.msk.f32.mxu1 %vm446_vm2, %v1038_v35 }
 0x2f3   :  { %v952_v38 = vpop.f32.mrb[54].mxu0 }
 0x2f4   :  { %v1039_v39 = vmax.f32 %v952_v38, 0.0  ;;  %v954_v23 = vpop.f32.mrb[55].mxu0 }
 0x2f6   :  { %4308 = vmatmul.mubr.msk.f32.gmra.mrb[40].mxu1 %vm446_vm2, %v1039_v39 }
 0x2f7   :  { %v957_v40 = vpop.f32.mrb[56].mxu0 }
 0x2f8   :  { %v1040_v42 = vmax.f32 %v957_v40, 0.0  ;;  %v959_v37 = vpop.f32.mrb[57].mxu0 }
 0x2fa   :  { %4310 = vmatprep.mubr.msk.f32.mxu1 %vm446_vm2, %v1040_v42 }
 0x2fb   :  { %v962_v22 = vpop.f32.mrb[58].mxu0 }
 0x2fc   :  { %v1041_v24 = vmax.f32 %v962_v22, 0.0  ;;  %v964_v34 = vpop.f32.mrb[59].mxu0 }
 0x2fe   :  { %4311 = vmatmul.mubr.msk.f32.gmra.mrb[42].mxu1 %vm446_vm2, %v1041_v24 }
 0x2ff   :  { %v967_v28 = vpop.f32.mrb[60].mxu0 }
 0x300   :  { %v1042_v36 = vmax.f32 %v967_v28, 0.0  ;;  %v969_v41 = vpop.f32.mrb[61].mxu0 }
 0x302   :  { %4313 = vmatprep.mubr.msk.f32.mxu1 %vm446_vm2, %v1042_v36 }
 0x303   :  { %v972_v35 = vpop.f32.mrb[62].mxu0 }
 0x304   :  { %v1043_v38 = vmax.f32 %v972_v35, 0.0  ;;  %v974_v23 = vpop.f32.mrb[63].mxu0 }
 0x306   :  { %4314 = vmatmul.mubr.msk.f32.gmra.mrb[44].mxu1 %vm446_vm2, %v1043_v38 }
 0x307   :  { %v977_v39 = vpop.f32.mrb[64].mxu0 }
 0x308   :  { %v1044_v40 = vmax.f32 %v977_v39, 0.0  ;;  %v979_v37 = vpop.f32.mrb[65].mxu0 }
 0x30a   :  { %4316 = vmatprep.mubr.msk.f32.mxu1 %vm446_vm2, %v1044_v40 }
 0x30b   :  { %v982_v42 = vpop.f32.mrb[66].mxu0 }
 0x30c   :  { %v1045_v22 = vmax.f32 %v982_v42, 0.0  ;;  %v984_v34 = vpop.f32.mrb[67].mxu0 }
 0x30e   :  { %4317 = vmatmul.mubr.msk.f32.gmra.mrb[46].mxu1 %vm446_vm2, %v1045_v22 }
 0x30f   :  { %v987_v24 = vpop.f32.mrb[68].mxu0 }
 0x310   :  { %v1046_v28 = vmax.f32 %v987_v24, 0.0  ;;  %v989_v41 = vpop.f32.mrb[69].mxu0 }
 0x312   :  { %4319 = vmatprep.mubr.msk.f32.mxu1 %vm446_vm2, %v1046_v28 }
 0x313   :  { %v992_v36 = vpop.f32.mrb[70].mxu0 }
 0x314   :  { %v1047_v35 = vmax.f32 %v992_v36, 0.0  ;;  %v994_v23 = vpop.f32.mrb[71].mxu0 }
 0x316   :  { %4320 = vmatmul.mubr.msk.f32.gmra.mrb[48].mxu1 %vm446_vm2, %v1047_v35 }
 0x317   :  { %v997_v38 = vpop.f32.mrb[72].mxu0 }
 0x318   :  { %v1048_v39 = vmax.f32 %v997_v38, 0.0  ;;  %v999_v37 = vpop.f32.mrb[73].mxu0 }
 0x31a   :  { %4322 = vmatprep.mubr.msk.f32.mxu1 %vm446_vm2, %v1048_v39 }
 0x31b   :  { %v1002_v40 = vpop.f32.mrb[74].mxu0 }
 0x31c   :  { %v1049_v42 = vmax.f32 %v1002_v40, 0.0  ;;  %v1004_v34 = vpop.f32.mrb[75].mxu0 }
 0x31e   :  { %4323 = vmatmul.mubr.msk.f32.gmra.mrb[50].mxu1 %vm446_vm2, %v1049_v42  ;;  %v5656_v42 = vld [vmem:[%s6148_s7] ss:$0 sm:$0xff] }
 0x31f   :  { %v1007_v22 = vpop.f32.mrb[76].mxu0 }
 0x320   :  { %v1050_v24 = vmax.f32 %v1007_v22, 0.0  ;;  %v1009_v41 = vpop.f32.mrb[77].mxu0 }
 0x322   :  { %4325 = vmatprep.mubr.msk.f32.mxu1 %vm446_vm2, %v1050_v24 }
 0x323   :  { %v1012_v28 = vpop.f32.mrb[78].mxu0 }
 0x324   :  { %v1051_v36 = vmax.f32 %v1012_v28, 0.0  ;;  %v1014_v23 = vpop.f32.mrb[79].mxu0 }
 0x325   :  { %v6168_v23 = vmov 0.0|0.0  }
 0x326   :  { %4326 = vmatmul.mubr.msk.f32.gmra.mrb[52].mxu1 %vm446_vm2, %v1051_v36 }
 0x327   :  { %v1017_v35 = vpop.f32.mrb[80].mxu0 }
 0x328   :  { %v1052_v38 = vmax.f32 %v1017_v35, 0.0  ;;  %v1019_v37 = vpop.f32.mrb[81].mxu0 }
 0x32a   :  { %4328 = vmatprep.mubr.msk.f32.mxu1 %vm446_vm2, %v1052_v38 }
 0x32b   :  { %v1022_v39 = vpop.f32.mrb[82].mxu0 }
 0x32c   :  { %v1053_v40 = vmax.f32 %v1022_v39, 0.0  ;;  %v1024_v34 = vpop.f32.mrb[83].mxu0 }
 0x32e   :  { %4329 = vmatmul.mubr.msk.f32.gmra.mrb[54].mxu1 %vm446_vm2, %v1053_v40 }
 0x32f   :  { %3890 = vmatprep.mubr.msk.f32.mxu1 %vm736_vm3, %v5203_v29 }
 0x399   :  { %v4291_v22 = vpop.f32.mrb[28].mxu1 }
 0x39a   :  { %v1221_v24 = vadd.f32 %v4291_v22, %v5656_v42  ;;  %v1215_v41 = vpop.f32.mrb[29].mxu1 }
 0x39b   :  { %v1216_v28 = vadd.f32 %v5656_v42, %v1215_v41 }
 0x39d   :  { %v4643_v36 = vpack.c.bf16 %v1221_v24, %v1216_v28 }
 0x39f   :  { %4644 = vmatpush1.bf16.msra.mxu1 %v4643_v36 }
 0x3a0   :  { %4645 = vmatprep.subr.bf16.mxu1 %v6168_v23 }
 0x3a1   :  { %v4294_v35 = vpop.f32.mrb[30].mxu1 }
 0x3a2   :  { %v1231_v38 = vadd.f32 %v4294_v35, %v5656_v42  ;;  %v1225_v37 = vpop.f32.mrb[31].mxu1 }
 0x3a3   :  { %v1226_v29 = vadd.f32 %v5656_v42, %v1225_v37 }
 0x3a5   :  { %v4646_v39 = vpack.c.bf16 %v1231_v38, %v1226_v29 }
 0x3a7   :  { %4647 = vmatpush1.bf16.msra.mxu1 %v4646_v39 }
 0x3a8   :  { %4648 = vmatprep.subr.bf16.mxu1 %v6168_v23 }
 0x3a9   :  { %v4297_v40 = vpop.f32.mrb[32].mxu1 }
 0x3aa   :  { %v1241_v34 = vadd.f32 %v4297_v40, %v5656_v42  ;;  %v1235_v22 = vpop.f32.mrb[33].mxu1 }
 0x3ab   :  { %v1236_v41 = vadd.f32 %v5656_v42, %v1235_v22 }
 0x3ad   :  { %v4649_v24 = vpack.c.bf16 %v1241_v34, %v1236_v41 }
 0x3af   :  { %4650 = vmatpush1.bf16.msra.mxu1 %v4649_v24 }
 0x3b0   :  { %4651 = vmatprep.subr.bf16.mxu1 %v6168_v23 }
 0x3b1   :  { %v4300_v28 = vpop.f32.mrb[34].mxu1 }
 0x3b2   :  { %v1251_v36 = vadd.f32 %v4300_v28, %v5656_v42  ;;  %v1245_v35 = vpop.f32.mrb[35].mxu1 }
 0x3b3   :  { %v1246_v37 = vadd.f32 %v5656_v42, %v1245_v35 }
 0x3b5   :  { %v4652_v38 = vpack.c.bf16 %v1251_v36, %v1246_v37 }
 0x3b7   :  { %4653 = vmatpush1.bf16.msra.mxu1 %v4652_v38 }
 0x3b8   :  { %4654 = vmatprep.subr.bf16.mxu1 %v6168_v23 }
 0x3b9   :  { %v4303_v29 = vpop.f32.mrb[36].mxu1 }
 0x3ba   :  { %v1261_v39 = vadd.f32 %v4303_v29, %v5656_v42  ;;  %v1255_v40 = vpop.f32.mrb[37].mxu1 }
 0x3bb   :  { %v1256_v22 = vadd.f32 %v5656_v42, %v1255_v40 }
 0x3bd   :  { %v4655_v34 = vpack.c.bf16 %v1261_v39, %v1256_v22 }
 0x3bf   :  { %4656 = vmatpush1.bf16.msra.mxu1 %v4655_v34 }
 0x3c0   :  { %4657 = vmatprep.subr.bf16.mxu1 %v6168_v23 }
 0x3c1   :  { %v4306_v41 = vpop.f32.mrb[38].mxu1 }
 0x3c2   :  { %v1271_v24 = vadd.f32 %v4306_v41, %v5656_v42  ;;  %v1265_v28 = vpop.f32.mrb[39].mxu1 }
 0x3c3   :  { %v1266_v35 = vadd.f32 %v5656_v42, %v1265_v28 }
 0x3c5   :  { %v4658_v36 = vpack.c.bf16 %v1271_v24, %v1266_v35 }
 0x3c7   :  { %4659 = vmatpush1.bf16.msra.mxu1 %v4658_v36 }
 0x3c8   :  { %4660 = vmatprep.subr.bf16.mxu1 %v6168_v23 }
 0x3c9   :  { %v4309_v37 = vpop.f32.mrb[40].mxu1 }
 0x3ca   :  { %v1281_v38 = vadd.f32 %v4309_v37, %v5656_v42  ;;  %v1275_v29 = vpop.f32.mrb[41].mxu1 }
 0x3cb   :  { %v1276_v40 = vadd.f32 %v5656_v42, %v1275_v29 }
 0x3cd   :  { %v4661_v39 = vpack.c.bf16 %v1281_v38, %v1276_v40 }
 0x3cf   :  { %4662 = vmatpush1.bf16.msra.mxu1 %v4661_v39 }
 0x3d0   :  { %4663 = vmatprep.subr.bf16.mxu1 %v6168_v23 }
 0x3d1   :  { %v4312_v22 = vpop.f32.mrb[42].mxu1 }
 0x3d2   :  { %v1291_v34 = vadd.f32 %v4312_v22, %v5656_v42  ;;  %v1285_v41 = vpop.f32.mrb[43].mxu1 }
 0x3d3   :  { %v1286_v28 = vadd.f32 %v5656_v42, %v1285_v41 }
 0x3d5   :  { %v4664_v24 = vpack.c.bf16 %v1291_v34, %v1286_v28 }
 0x3d7   :  { %4665 = vmatpush1.bf16.msra.mxu1 %v4664_v24 }
 0x3d8   :  { %4666 = vmatprep.subr.bf16.mxu1 %v6168_v23 }
 0x3d9   :  { %v4315_v35 = vpop.f32.mrb[44].mxu1 }
 0x3da   :  { %v1301_v36 = vadd.f32 %v4315_v35, %v5656_v42  ;;  %v1295_v37 = vpop.f32.mrb[45].mxu1 }
 0x3db   :  { %v1296_v29 = vadd.f32 %v5656_v42, %v1295_v37 }
 0x3dd   :  { %v4667_v38 = vpack.c.bf16 %v1301_v36, %v1296_v29 }
 0x3df   :  { %4668 = vmatpush1.bf16.msra.mxu1 %v4667_v38 }
 0x3e0   :  { %4669 = vmatprep.subr.bf16.mxu1 %v6168_v23 }
 0x3e1   :  { %v4318_v40 = vpop.f32.mrb[46].mxu1 }
 0x3e2   :  { %v1311_v39 = vadd.f32 %v4318_v40, %v5656_v42  ;;  %v1305_v22 = vpop.f32.mrb[47].mxu1 }
 0x3e3   :  { %v1306_v41 = vadd.f32 %v5656_v42, %v1305_v22 }
 0x3e5   :  { %v4670_v34 = vpack.c.bf16 %v1311_v39, %v1306_v41  ;;  %v1588_v39 = vld [vmem:[%s6149_s8] sm:$0xff]  ;;  %v1589_v41 = vld [vmem:[%s6149_s8 + $0x8] sm:$0xff] }
 0x3e7   :  { %4671 = vmatpush1.bf16.msra.mxu1 %v4670_v34  ;;  %v4684_v34 = vpack.c.bf16 %v1589_v41, %v1588_v39 }
 0x3e8   :  { %4672 = vmatprep.subr.bf16.mxu1 %v6168_v23 }
 0x3e9   :  { %v4321_v28 = vpop.f32.mrb[48].mxu1  ;;  %4685 = vmatprep.subr.bf16.mxu0 %v4684_v34 }
 0x3ea   :  { %v1321_v24 = vadd.f32 %v4321_v28, %v5656_v42  ;;  %v1315_v35 = vpop.f32.mrb[49].mxu1  ;;  %4687 = vmatpush3.bf16.msra.mxu0 %v4684_v34 }
 0x3eb   :  { %v1316_v37 = vadd.f32 %v5656_v42, %v1315_v35  ;;  %v1591_v35 = vld [vmem:[%s6149_s8 + $0x18] sm:$0xff] }
 0x3ed   :  { %v4673_v36 = vpack.c.bf16 %v1321_v24, %v1316_v37  ;;  %v1590_v24 = vld [vmem:[%s6149_s8 + $0x10] sm:$0xff] }
 0x3ee   :  { %v4688_v37 = vpack.c.bf16 %v1591_v35, %v1590_v24  ;;  %v2812_v24 = vld [vmem:[%s6150_s10] sm:$0xff]  ;;  %v2813_v35 = vld [vmem:[%s6150_s10 + $0x8] sm:$0xff] }
 0x3ef   :  { %4674 = vmatpush1.bf16.msra.mxu1 %v4673_v36 }
 0x3f0   :  { %4675 = vmatprep.subr.bf16.mxu1 %v6168_v23  ;;  %4689 = vmatprep.subr.bf16.mxu0 %v4688_v37 }
 0x3f1   :  { %v4324_v29 = vpop.f32.mrb[50].mxu1  ;;  %4691 = vmatpush3.bf16.msra.mxu0 %v4688_v37  ;;  %v5717_v37 = vpack.c.bf16 %v2813_v35, %v2812_v24  ;;  %v2030_v24 = vld [vmem:[%s6149_s8 + $0xa8] sm:$0xff] }
 0x3f2   :  { %v1331_v38 = vadd.f32 %v4324_v29, %v5656_v42  ;;  %v1325_v40 = vpop.f32.mrb[51].mxu1 }
 0x3f3   :  { %v1326_v22 = vadd.f32 %v5656_v42, %v1325_v40 }
 0x3f5   :  { %v4676_v28 = vpack.c.bf16 %v1331_v38, %v1326_v22 }
 0x3f7   :  { %4677 = vmatpush1.bf16.msra.mxu1 %v4676_v28 }
 0x3f8   :  { %4678 = vmatprep.subr.bf16.mxu1 %v6168_v23 }
 0x3f9   :  { %v4327_v36 = vpop.f32.mrb[52].mxu1 }
 0x3fa   :  { %v1341_v29 = vadd.f32 %v4327_v36, %v5656_v42  ;;  %v1335_v40 = vpop.f32.mrb[53].mxu1 }
 0x3fb   :  { %v1336_v38 = vadd.f32 %v5656_v42, %v1335_v40 }
 0x3fd   :  { %v4679_v22 = vpack.c.bf16 %v1341_v29, %v1336_v38  ;;  %v2814_v29 = vld [vmem:[%s6150_s10 + $0x10] sm:$0xff]  ;;  %v1945_v38 = vld [vmem:[%s6149_s8 + $0x98] sm:$0xff] }
 0x3ff   :  { %4680 = vmatpush1.bf16.msra.mxu1 %v4679_v22 }
 0x400   :  { %4681 = vmatprep.subr.bf16.mxu1 %v6168_v23 }
 0x401   :  { %v4330_v39 = vpop.f32.mrb[54].mxu1 }
 0x402   :  { %v1351_v41 = vadd.f32 %v4330_v39, %v5656_v42  ;;  %v1345_v28 = vpop.f32.mrb[55].mxu1 }
 0x403   :  { %v1346_v34 = vadd.f32 %v5656_v42, %v1345_v28  ;;  %v2815_v42 = vld [vmem:[%s6150_s10 + $0x18] sm:$0xff] }
 0x404   :  { %v5730_v40 = vpack.c.bf16 %v2815_v42, %v2814_v29 }
 0x405   :  { %v4682_v36 = vpack.c.bf16 %v1351_v41, %v1346_v34  ;;  %v2029_v34 = vld [vmem:[%s6149_s8 + $0xa0] sm:$0xff] }
 0x406   :  { %v4724_v42 = vpack.c.bf16 %v2030_v24, %v2029_v34  ;;  %v2464_v34 = vld [vmem:[%s6149_s8 + $0x140] sm:$0xff]  ;;  %v2465_v24 = vld [vmem:[%s6149_s8 + $0x148] sm:$0xff] }
 0x407   :  { %4683 = vmatpush1.bf16.msra.mxu1 %v4682_v36 }
 0x408   :  { %4796 = vmatprep.subr.bf16.mxu1 %v6168_v23 }
 0x40a   :  { %1419 = vmatmul.mubr.f32.vlgmr.msra.gmra.mrb[56].mxu1 %v5262_v43  ;;  %v1681_v43 = vld [vmem:[%s6149_s8 + $0x20] sm:$0xff] }
 0x40b   :  { %3891 = vmatprep.mubr.msk.f32.mxu1 %vm736_vm3, %v5267_v44  ;;  %4798 = vmatpush3.bf16.msra.mxu1 %v5717_v37  ;;  %v1682_v44 = vld [vmem:[%s6149_s8 + $0x28] sm:$0xff] }
 0x40c   :  { %4799 = vmatprep.subr.bf16.mxu1 %v6168_v23 }
 0x40e   :  { %1424 = vmatmul.mubr.f32.gmra.mrb[58].mxu1 %v5275_v30  ;;  %v4692_v30 = vpack.c.bf16 %v1682_v44, %v1681_v43  ;;  %v2031_v43 = vld [vmem:[%s6149_s8 + $0xb0] sm:$0xff]  ;;  %v2032_v44 = vld [vmem:[%s6149_s8 + $0xb8] sm:$0xff] }
 0x40f   :  { %3892 = vmatprep.mubr.msk.f32.mxu1 %vm736_vm3, %v5280_v45  ;;  %4801 = vmatpush3.bf16.msra.mxu1 %v5730_v40  ;;  %v6169_v45 = vld [vmem:[#allocation3_spill] sm:$0xff] }
 0x410   :  { %4802 = vmatprep.subr.bf16.mxu1 %v6168_v23  ;;  %4693 = vmatprep.subr.bf16.mxu0 %v4692_v30 }
 0x412   :  { %1429 = vmatmul.mubr.f32.gmra.mrb[60].mxu1 %v5288_v46  ;;  %v6170_v46 = vld [vmem:[#allocation4_spill] sm:$0xff] }
 0x413   :  { %3893 = vmatprep.mubr.msk.f32.mxu1 %vm736_vm3, %v5293_v47  ;;  %v6171_v47 = vld [vmem:[#allocation5_spill] sm:$0xff] }
 0x416   :  { %1434 = vmatmul.mubr.f32.gmra.mrb[62].mxu1 %v5301_v48  ;;  %v6172_v48 = vld [vmem:[#allocation6_spill] sm:$0xff] }
 0x417   :  { %3894 = vmatprep.mubr.msk.f32.mxu1 %vm736_vm3, %v5306_v49  ;;  %v6173_v49 = vld [vmem:[#allocation7_spill] sm:$0xff] }
 0x41a   :  { %1439 = vmatmul.mubr.f32.gmra.mrb[64].mxu1 %v5314_v50  ;;  %v4933_v50 = vmov 0.0  }
 0x41b   :  { %3895 = vmatprep.mubr.msk.f32.mxu1 %vm736_vm3, %v5319_v51  ;;  %v3948_v51 = vld [vmem:[%s6151_s11] ss:$0 sm:$0xff] }
 0x41c   :  { %2902 = vrot.lane.b32.xlu0 %v3948_v51, %s4934_s23 }
 0x41e   :  { %1444 = vmatmul.mubr.f32.gmra.mrb[66].mxu1 %v5327_v52 }
 0x41f   :  { %3896 = vmatprep.mubr.msk.f32.mxu1 %vm736_vm3, %v5332_v53 }
 0x422   :  { %1449 = vmatmul.mubr.f32.gmra.mrb[68].mxu1 %v5340_v54 }
 0x423   :  { %3897 = vmatprep.mubr.msk.f32.mxu1 %vm736_vm3, %v5345_v55  ;;  %v1683_v55 = vld [vmem:[%s6149_s8 + $0x30] sm:$0xff] }
 0x426   :  { %1454 = vmatmul.mubr.f32.gmra.mrb[70].mxu1 %v5353_v56  ;;  %v1684_v56 = vld [vmem:[%s6149_s8 + $0x38] sm:$0xff] }
 0x427   :  { %3898 = vmatprep.mubr.msk.f32.mxu1 %vm736_vm3, %v5358_v57 }
 0x42a   :  { %1459 = vmatmul.mubr.f32.gmra.mrb[72].mxu1 %v5366_v58 }
 0x42b   :  { %3899 = vmatprep.mubr.msk.f32.mxu1 %vm736_vm3, %v5371_v59 }
 0x42e   :  { %1464 = vmatmul.mubr.f32.gmra.mrb[74].mxu1 %v5379_v60  ;;  %v4696_v60 = vpack.c.bf16 %v1684_v56, %v1683_v55  ;;  %v2118_v55 = vld [vmem:[%s6149_s8 + $0xd0] sm:$0xff]  ;;  %v2119_v56 = vld [vmem:[%s6149_s8 + $0xd8] sm:$0xff] }
 0x42f   :  { %3900 = vmatprep.mubr.msk.f32.mxu1 %vm736_vm3, %v5384_v61  ;;  %v1768_v61 = vld [vmem:[%s6149_s8 + $0x40] sm:$0xff] }
 0x432   :  { %1469 = vmatmul.mubr.f32.gmra.mrb[76].mxu1 %v5392_v62  ;;  %v1769_v62 = vld [vmem:[%s6149_s8 + $0x48] sm:$0xff] }
 0x433   :  { %3901 = vmatprep.mubr.msk.f32.mxu1 %vm736_vm3, %v5397_v63 }
 0x436   :  { %1474 = vmatmul.mubr.f32.gmra.mrb[78].mxu1 %v5405_v0 }
 0x437   :  { %3902 = vmatprep.mubr.msk.f32.mxu1 %vm736_vm3, %v5410_v1 }
 0x43a   :  { %1479 = vmatmul.mubr.f32.gmra.mrb[80].mxu1 %v5418_v2  ;;  %v4700_v2 = vpack.c.bf16 %v1769_v62, %v1768_v61  ;;  %v2203_v61 = vld [vmem:[%s6149_s8 + $0xe0] sm:$0xff]  ;;  %v2204_v62 = vld [vmem:[%s6149_s8 + $0xe8] sm:$0xff] }
 0x43b   :  { %3903 = vmatprep.mubr.msk.f32.mxu1 %vm736_vm3, %v5423_v3  ;;  %v1770_v3 = vld [vmem:[%s6149_s8 + $0x50] sm:$0xff] }
 0x43e   :  { %1484 = vmatmul.mubr.f32.gmra.mrb[82].mxu1 %v5431_v4  ;;  %v1771_v4 = vld [vmem:[%s6149_s8 + $0x58] sm:$0xff] }
 0x43f   :  { %3904 = vmatprep.mubr.msk.f32.mxu1 %vm736_vm3, %v5436_v5 }
 0x442   :  { %1489 = vmatmul.mubr.f32.gmra.mrb[84].mxu1 %v5444_v6 }
 0x443   :  { %3905 = vmatprep.mubr.msk.f32.mxu1 %vm736_vm3, %v5449_v7 }
 0x446   :  { %1494 = vmatmul.mubr.f32.gmra.mrb[86].mxu1 %v5457_v8  ;;  %v4704_v8 = vpack.c.bf16 %v1771_v4, %v1770_v3  ;;  %v2205_v3 = vld [vmem:[%s6149_s8 + $0xf0] sm:$0xff]  ;;  %v2206_v4 = vld [vmem:[%s6149_s8 + $0xf8] sm:$0xff] }
 0x447   :  { %3906 = vmatprep.mubr.msk.f32.mxu1 %vm736_vm3, %v5462_v9  ;;  %v1855_v9 = vld [vmem:[%s6149_s8 + $0x60] sm:$0xff] }
 0x44a   :  { %1499 = vmatmul.mubr.f32.gmra.mrb[88].mxu1 %v5470_v10  ;;  %v1856_v10 = vld [vmem:[%s6149_s8 + $0x68] sm:$0xff] }
 0x44b   :  { %3907 = vmatprep.mubr.msk.f32.mxu1 %vm736_vm3, %v5475_v11 }
 0x44e   :  { %1504 = vmatmul.mubr.f32.gmra.mrb[90].mxu1 %v5483_v12 }
 0x44f   :  { %3908 = vmatprep.mubr.msk.f32.mxu1 %vm736_vm3, %v5488_v13 }
 0x452   :  { %1509 = vmatmul.mubr.f32.gmra.mrb[92].mxu1 %v5496_v14  ;;  %v4708_v14 = vpack.c.bf16 %v1856_v10, %v1855_v9  ;;  %v2290_v9 = vld [vmem:[%s6149_s8 + $0x100] sm:$0xff]  ;;  %v2291_v10 = vld [vmem:[%s6149_s8 + $0x108] sm:$0xff] }
 0x453   :  { %3909 = vmatprep.mubr.msk.f32.mxu1 %vm736_vm3, %v5501_v15  ;;  %v1857_v15 = vld [vmem:[%s6149_s8 + $0x70] sm:$0xff] }
 0x456   :  { %1514 = vmatmul.mubr.f32.gmra.mrb[94].mxu1 %v5509_v16  ;;  %v1858_v16 = vld [vmem:[%s6149_s8 + $0x78] sm:$0xff] }
 0x457   :  { %3910 = vmatprep.mubr.msk.f32.mxu1 %vm736_vm3, %v5514_v17 }
 0x45a   :  { %1519 = vmatmul.mubr.f32.gmra.mrb[96].mxu1 %v5522_v18 }
 0x45b   :  { %3911 = vmatprep.mubr.msk.f32.mxu1 %vm736_vm3, %v5527_v19 }
 0x45e   :  { %1524 = vmatmul.mubr.f32.gmra.mrb[98].mxu1 %v5535_v20  ;;  %v4712_v20 = vpack.c.bf16 %v1858_v16, %v1857_v15  ;;  %v2292_v15 = vld [vmem:[%s6149_s8 + $0x110] sm:$0xff]  ;;  %v2293_v16 = vld [vmem:[%s6149_s8 + $0x118] sm:$0xff] }
 0x45f   :  { %3912 = vmatprep.mubr.msk.f32.mxu1 %vm736_vm3, %v5540_v21  ;;  %v1942_v21 = vld [vmem:[%s6149_s8 + $0x80] sm:$0xff] }
 0x462   :  { %1529 = vmatmul.mubr.f32.gmra.mrb[100].mxu1 %v5554_v25  ;;  %v1943_v25 = vld [vmem:[%s6149_s8 + $0x88] sm:$0xff] }
 0x463   :  { %3913 = vmatprep.mubr.msk.f32.mxu1 %vm736_vm3, %v5559_v26 }
 0x466   :  { %1534 = vmatmul.mubr.f32.gmra.mrb[102].mxu1 %v5568_v27 }
 0x467   :  { %3914 = vmatprep.mubr.msk.f32.mxu1 %vm736_vm3, %v5573_v31 }
 0x46a   :  { %1539 = vmatmul.mubr.f32.gmra.mrb[104].mxu1 %v5581_v32  ;;  %v4716_v32 = vpack.c.bf16 %v1943_v25, %v1942_v21  ;;  %v2377_v21 = vld [vmem:[%s6149_s8 + $0x120] sm:$0xff]  ;;  %v2378_v25 = vld [vmem:[%s6149_s8 + $0x128] sm:$0xff] }
 0x46b   :  { %3915 = vmatprep.mubr.msk.f32.mxu1 %vm736_vm3, %v5586_v33  ;;  %v1944_v33 = vld [vmem:[%s6149_s8 + $0x90] sm:$0xff] }
 0x46c   :  { %v4720_v28 = vpack.c.bf16 %v1945_v38, %v1944_v33  ;;  %v2379_v33 = vld [vmem:[%s6149_s8 + $0x130] sm:$0xff]  ;;  %v2380_v38 = vld [vmem:[%s6149_s8 + $0x138] sm:$0xff] }
 0x46e   :  { %1544 = vmatmul.mubr.f32.gmra.mrb[106].mxu1 %v6169_v45 }
 0x46f   :  { %3916 = vmatprep.mubr.msk.f32.mxu1 %vm736_vm3, %v6170_v46 }
 0x472   :  { %1549 = vmatmul.mubr.f32.gmra.mrb[108].mxu1 %v6171_v47  ;;  %v4728_v47 = vpack.c.bf16 %v2032_v44, %v2031_v43  ;;  %v2466_v43 = vld [vmem:[%s6149_s8 + $0x150] sm:$0xff]  ;;  %v2467_v44 = vld [vmem:[%s6149_s8 + $0x158] sm:$0xff] }
 0x473   :  { %3917 = vmatprep.mubr.msk.f32.mxu1 %vm736_vm3, %v6172_v48  ;;  %v2116_v48 = vld [vmem:[%s6149_s8 + $0xc0] sm:$0xff] }
 0x476   :  { %1554 = vmatmul.mubr.f32.gmra.mrb[110].mxu1 %v6173_v49  ;;  %v2117_v49 = vld [vmem:[%s6149_s8 + $0xc8] sm:$0xff] }
 0x477   :  { %4493 = vmatprep.mubr.msk.f32.mxu1 %vm4932_vm4, %v4933_v50 }
 0x47a   :  { %4494 = vmatmul.mubr.f32.vlgmr.msra.gmra.mrb[112].mxu1 %v4933_v50 }
 0x47b   :  { %4804 = vmatpush3.bf16.msra.mxu1 %v5717_v37  ;;  %4504 = vmatprep.mubr.msk.f32.mxu1 %vm4932_vm4, %v4933_v50 }
 0x47c   :  { %4805 = vmatprep.subr.bf16.mxu1 %v6168_v23 }
 0x47f   :  { %4807 = vmatpush3.bf16.msra.mxu1 %v5730_v40 }
 0x480   :  { %4808 = vmatprep.subr.bf16.mxu1 %v6168_v23 }
 0x4dd   :  { %v1420_v52 = vpop.f32.mrb[56].mxu1 }
 0x4de   :  { %v1559_v53 = vmax.f32 %v1420_v52, 0.0  ;;  %v1422_v54 = vpop.f32.mrb[57].mxu1 }
 0x4df   :  { %v4732_v54 = vpack.c.bf16 %v2117_v49, %v2116_v48  ;;  %v2551_v48 = vld [vmem:[%s6149_s8 + $0x160] sm:$0xff]  ;;  %v2552_v49 = vld [vmem:[%s6149_s8 + $0x168] sm:$0xff] }
 0x4e0   :  { %4339 = vmatprep.mubr.msk.f32.mxu0 %vm446_vm2, %v1559_v53 }
 0x4e1   :  { %v1425_v57 = vpop.f32.mrb[58].mxu1 }
 0x4e2   :  { %v1560_v58 = vmax.f32 %v1425_v57, 0.0  ;;  %v1427_v59 = vpop.f32.mrb[59].mxu1 }
 0x4e4   :  { %4340 = vmatmul.mubr.msk.f32.vlgmr.msra.gmra.mrb[84].mxu0 %vm446_vm2, %v1560_v58 }
 0x4e5   :  { %v1430_v63 = vpop.f32.mrb[60].mxu1  ;;  %4695 = vmatpush3.bf16.msra.mxu0 %v4692_v30 }
 0x4e6   :  { %v1561_v0 = vmax.f32 %v1430_v63, 0.0  ;;  %v1432_v1 = vpop.f32.mrb[61].mxu1  ;;  %4697 = vmatprep.subr.bf16.mxu0 %v4696_v60 }
 0x4e8   :  { %4350 = vmatprep.mubr.msk.f32.mxu0 %vm446_vm2, %v1561_v0 }
 0x4e9   :  { %v1435_v5 = vpop.f32.mrb[62].mxu1  ;;  %4699 = vmatpush3.bf16.msra.mxu0 %v4696_v60  ;;  %v4736_v60 = vpack.c.bf16 %v2119_v56, %v2118_v55  ;;  %v2553_v55 = vld [vmem:[%s6149_s8 + $0x170] sm:$0xff]  ;;  %v2554_v56 = vld [vmem:[%s6149_s8 + $0x178] sm:$0xff] }
 0x4ea   :  { %v1562_v6 = vmax.f32 %v1435_v5, 0.0  ;;  %v1437_v7 = vpop.f32.mrb[63].mxu1  ;;  %4701 = vmatprep.subr.bf16.mxu0 %v4700_v2 }
 0x4ec   :  { %4351 = vmatmul.mubr.msk.f32.vlgmr.msra.gmra.mrb[84].mxu0 %vm446_vm2, %v1562_v6 }
 0x4ed   :  { %v1440_v11 = vpop.f32.mrb[64].mxu1  ;;  %4703 = vmatpush3.bf16.msra.mxu0 %v4700_v2  ;;  %v4740_v2 = vpack.c.bf16 %v2204_v62, %v2203_v61  ;;  %v2638_v61 = vld [vmem:[%s6149_s8 + $0x180] sm:$0xff]  ;;  %v2639_v62 = vld [vmem:[%s6149_s8 + $0x188] sm:$0xff] }
 0x4ee   :  { %v1563_v12 = vmax.f32 %v1440_v11, 0.0  ;;  %v1442_v13 = vpop.f32.mrb[65].mxu1  ;;  %4705 = vmatprep.subr.bf16.mxu0 %v4704_v8 }
 0x4f0   :  { %4361 = vmatprep.mubr.msk.f32.mxu0 %vm446_vm2, %v1563_v12 }
 0x4f1   :  { %v1445_v17 = vpop.f32.mrb[66].mxu1  ;;  %4707 = vmatpush3.bf16.msra.mxu0 %v4704_v8  ;;  %v4744_v8 = vpack.c.bf16 %v2206_v4, %v2205_v3  ;;  %v2640_v3 = vld [vmem:[%s6149_s8 + $0x190] sm:$0xff]  ;;  %v2641_v4 = vld [vmem:[%s6149_s8 + $0x198] sm:$0xff] }
 0x4f2   :  { %v1564_v18 = vmax.f32 %v1445_v17, 0.0  ;;  %v1447_v19 = vpop.f32.mrb[67].mxu1  ;;  %4709 = vmatprep.subr.bf16.mxu0 %v4708_v14 }
 0x4f4   :  { %4362 = vmatmul.mubr.msk.f32.vlgmr.msra.gmra.mrb[84].mxu0 %vm446_vm2, %v1564_v18 }
 0x4f5   :  { %v1450_v26 = vpop.f32.mrb[68].mxu1  ;;  %4711 = vmatpush3.bf16.msra.mxu0 %v4708_v14  ;;  %v4748_v14 = vpack.c.bf16 %v2291_v10, %v2290_v9  ;;  %v2725_v9 = vld [vmem:[%s6149_s8 + $0x1a0] sm:$0xff]  ;;  %v2726_v10 = vld [vmem:[%s6149_s8 + $0x1a8] sm:$0xff] }
 0x4f6   :  { %v1565_v27 = vmax.f32 %v1450_v26, 0.0  ;;  %v1452_v31 = vpop.f32.mrb[69].mxu1  ;;  %4713 = vmatprep.subr.bf16.mxu0 %v4712_v20 }
 0x4f8   :  { %4372 = vmatprep.mubr.msk.f32.mxu0 %vm446_vm2, %v1565_v27 }
 0x4f9   :  { %v1455_v22 = vpop.f32.mrb[70].mxu1  ;;  %4715 = vmatpush3.bf16.msra.mxu0 %v4712_v20  ;;  %v4752_v20 = vpack.c.bf16 %v2293_v16, %v2292_v15  ;;  %v2727_v15 = vld [vmem:[%s6149_s8 + $0x1b0] sm:$0xff]  ;;  %v2728_v16 = vld [vmem:[%s6149_s8 + $0x1b8] sm:$0xff] }
 0x4fa   :  { %v1566_v39 = vmax.f32 %v1455_v22, 0.0  ;;  %v1457_v41 = vpop.f32.mrb[71].mxu1  ;;  %4717 = vmatprep.subr.bf16.mxu0 %v4716_v32 }
 0x4fc   :  { %4373 = vmatmul.mubr.msk.f32.vlgmr.msra.gmra.mrb[84].mxu0 %vm446_vm2, %v1566_v39 }
 0x4fd   :  { %v1460_v35 = vpop.f32.mrb[72].mxu1  ;;  %4719 = vmatpush3.bf16.msra.mxu0 %v4716_v32  ;;  %v4756_v32 = vpack.c.bf16 %v2378_v25, %v2377_v21 }
 0x4fe   :  { %v1567_v36 = vmax.f32 %v1460_v35, 0.0  ;;  %v1462_v29 = vpop.f32.mrb[73].mxu1  ;;  %4721 = vmatprep.subr.bf16.mxu0 %v4720_v28 }
 0x500   :  { %4383 = vmatprep.mubr.msk.f32.mxu0 %vm446_vm2, %v1567_v36 }
 0x501   :  { %v1465_v30 = vpop.f32.mrb[74].mxu1  ;;  %4723 = vmatpush3.bf16.msra.mxu0 %v4720_v28  ;;  %v4760_v28 = vpack.c.bf16 %v2380_v38, %v2379_v33  ;;  %v6011_v33 = vpop.permute.xlu0 %2902 }
 0x502   :  { %v1568_v45 = vmax.f32 %v1465_v30, 0.0  ;;  %v1467_v46 = vpop.f32.mrb[75].mxu1  ;;  %4725 = vmatprep.subr.bf16.mxu0 %v4724_v42 }
 0x504   :  { %4384 = vmatmul.mubr.msk.f32.vlgmr.msra.gmra.mrb[84].mxu0 %vm446_vm2, %v1568_v45 }
 0x505   :  { %v1470_v51 = vpop.f32.mrb[76].mxu1  ;;  %4727 = vmatpush3.bf16.msra.mxu0 %v4724_v42  ;;  %v4764_v42 = vpack.c.bf16 %v2465_v24, %v2464_v34 }
 0x506   :  { %v1569_v52 = vmax.f32 %v1470_v51, 0.0  ;;  %v1472_v53 = vpop.f32.mrb[77].mxu1  ;;  %4729 = vmatprep.subr.bf16.mxu0 %v4728_v47 }
 0x508   :  { %4394 = vmatprep.mubr.msk.f32.mxu0 %vm446_vm2, %v1569_v52 }
 0x509   :  { %v1475_v57 = vpop.f32.mrb[78].mxu1  ;;  %4731 = vmatpush3.bf16.msra.mxu0 %v4728_v47  ;;  %v4768_v47 = vpack.c.bf16 %v2467_v44, %v2466_v43 }
 0x50a   :  { %v1570_v58 = vmax.f32 %v1475_v57, 0.0  ;;  %v1477_v59 = vpop.f32.mrb[79].mxu1  ;;  %4733 = vmatprep.subr.bf16.mxu0 %v4732_v54 }
 0x50c   :  { %4395 = vmatmul.mubr.msk.f32.vlgmr.msra.gmra.mrb[84].mxu0 %vm446_vm2, %v1570_v58 }
 0x50d   :  { %v1480_v63 = vpop.f32.mrb[80].mxu1  ;;  %4735 = vmatpush3.bf16.msra.mxu0 %v4732_v54  ;;  %v4772_v54 = vpack.c.bf16 %v2552_v49, %v2551_v48 }
 0x50e   :  { %v1571_v0 = vmax.f32 %v1480_v63, 0.0  ;;  %v1482_v1 = vpop.f32.mrb[81].mxu1  ;;  %4737 = vmatprep.subr.bf16.mxu0 %v4736_v60 }
 0x510   :  { %4405 = vmatprep.mubr.msk.f32.mxu0 %vm446_vm2, %v1571_v0 }
 0x511   :  { %v1485_v5 = vpop.f32.mrb[82].mxu1  ;;  %4739 = vmatpush3.bf16.msra.mxu0 %v4736_v60  ;;  %v4776_v60 = vpack.c.bf16 %v2554_v56, %v2553_v55 }
 0x512   :  { %v1572_v6 = vmax.f32 %v1485_v5, 0.0  ;;  %v1487_v7 = vpop.f32.mrb[83].mxu1  ;;  %4741 = vmatprep.subr.bf16.mxu0 %v4740_v2 }
 0x514   :  { %4406 = vmatmul.mubr.msk.f32.vlgmr.msra.gmra.mrb[84].mxu0 %vm446_vm2, %v1572_v6 }
 0x515   :  { %v1490_v11 = vpop.f32.mrb[84].mxu1  ;;  %4743 = vmatpush3.bf16.msra.mxu0 %v4740_v2  ;;  %v4780_v2 = vpack.c.bf16 %v2639_v62, %v2638_v61 }
 0x516   :  { %v1573_v12 = vmax.f32 %v1490_v11, 0.0  ;;  %v1492_v13 = vpop.f32.mrb[85].mxu1  ;;  %4745 = vmatprep.subr.bf16.mxu0 %v4744_v8 }
 0x518   :  { %4416 = vmatprep.mubr.msk.f32.mxu0 %vm446_vm2, %v1573_v12 }
 0x519   :  { %v1495_v17 = vpop.f32.mrb[86].mxu1  ;;  %4747 = vmatpush3.bf16.msra.mxu0 %v4744_v8  ;;  %v4784_v8 = vpack.c.bf16 %v2641_v4, %v2640_v3 }
 0x51a   :  { %v1574_v18 = vmax.f32 %v1495_v17, 0.0  ;;  %v1497_v19 = vpop.f32.mrb[87].mxu1  ;;  %4749 = vmatprep.subr.bf16.mxu0 %v4748_v14 }
 0x51c   :  { %4417 = vmatmul.mubr.msk.f32.vlgmr.msra.gmra.mrb[84].mxu0 %vm446_vm2, %v1574_v18 }
 0x51d   :  { %v1500_v26 = vpop.f32.mrb[88].mxu1  ;;  %4751 = vmatpush3.bf16.msra.mxu0 %v4748_v14  ;;  %v4788_v14 = vpack.c.bf16 %v2726_v10, %v2725_v9 }
 0x51e   :  { %v1575_v27 = vmax.f32 %v1500_v26, 0.0  ;;  %v1502_v31 = vpop.f32.mrb[89].mxu1  ;;  %4753 = vmatprep.subr.bf16.mxu0 %v4752_v20 }
 0x520   :  { %4427 = vmatprep.mubr.msk.f32.mxu0 %vm446_vm2, %v1575_v27 }
 0x521   :  { %v1505_v22 = vpop.f32.mrb[90].mxu1  ;;  %4755 = vmatpush3.bf16.msra.mxu0 %v4752_v20  ;;  %v4792_v20 = vpack.c.bf16 %v2728_v16, %v2727_v15 }
 0x522   :  { %v1576_v39 = vmax.f32 %v1505_v22, 0.0  ;;  %v1507_v41 = vpop.f32.mrb[91].mxu1  ;;  %4757 = vmatprep.subr.bf16.mxu0 %v4756_v32 }
 0x523   :  { %v3920_v41 = vld [vmem:[%s6152_s9] ss:$0 sm:$0xff]  ;;  %s4935_s9 = smov 96  }
 0x524   :  { %4428 = vmatmul.mubr.msk.f32.vlgmr.msra.gmra.mrb[84].mxu0 %vm446_vm2, %v1576_v39 }
 0x525   :  { %v1510_v35 = vpop.f32.mrb[92].mxu1  ;;  %4759 = vmatpush3.bf16.msra.mxu0 %v4756_v32 }
 0x526   :  { %v1577_v36 = vmax.f32 %v1510_v35, 0.0  ;;  %v1512_v29 = vpop.f32.mrb[93].mxu1  ;;  %4761 = vmatprep.subr.bf16.mxu0 %v4760_v28 }
 0x528   :  { %4438 = vmatprep.mubr.msk.f32.mxu0 %vm446_vm2, %v1577_v36 }
 0x529   :  { %v1515_v30 = vpop.f32.mrb[94].mxu1  ;;  %4763 = vmatpush3.bf16.msra.mxu0 %v4760_v28 }
 0x52a   :  { %v1578_v45 = vmax.f32 %v1515_v30, 0.0  ;;  %v1517_v46 = vpop.f32.mrb[95].mxu1  ;;  %4765 = vmatprep.subr.bf16.mxu0 %v4764_v42 }
 0x52c   :  { %4439 = vmatmul.mubr.msk.f32.vlgmr.msra.gmra.mrb[84].mxu0 %vm446_vm2, %v1578_v45 }
 0x52d   :  { %v1520_v51 = vpop.f32.mrb[96].mxu1  ;;  %4767 = vmatpush3.bf16.msra.mxu0 %v4764_v42 }
 0x52e   :  { %v1579_v52 = vmax.f32 %v1520_v51, 0.0  ;;  %v1522_v53 = vpop.f32.mrb[97].mxu1  ;;  %4769 = vmatprep.subr.bf16.mxu0 %v4768_v47 }
 0x530   :  { %4449 = vmatprep.mubr.msk.f32.mxu0 %vm446_vm2, %v1579_v52 }
 0x531   :  { %v1525_v57 = vpop.f32.mrb[98].mxu1  ;;  %4771 = vmatpush3.bf16.msra.mxu0 %v4768_v47 }
 0x532   :  { %v1580_v58 = vmax.f32 %v1525_v57, 0.0  ;;  %v1527_v59 = vpop.f32.mrb[99].mxu1  ;;  %4773 = vmatprep.subr.bf16.mxu0 %v4772_v54 }
 0x534   :  { %4450 = vmatmul.mubr.msk.f32.vlgmr.msra.gmra.mrb[84].mxu0 %vm446_vm2, %v1580_v58 }
 0x535   :  { %v1530_v63 = vpop.f32.mrb[100].mxu1  ;;  %4775 = vmatpush3.bf16.msra.mxu0 %v4772_v54 }
 0x536   :  { %v1581_v0 = vmax.f32 %v1530_v63, 0.0  ;;  %v1532_v1 = vpop.f32.mrb[101].mxu1  ;;  %4777 = vmatprep.subr.bf16.mxu0 %v4776_v60 }
 0x538   :  { %4460 = vmatprep.mubr.msk.f32.mxu0 %vm446_vm2, %v1581_v0 }
 0x539   :  { %v1535_v5 = vpop.f32.mrb[102].mxu1  ;;  %4779 = vmatpush3.bf16.msra.mxu0 %v4776_v60 }
 0x53a   :  { %v1582_v6 = vmax.f32 %v1535_v5, 0.0  ;;  %v1537_v7 = vpop.f32.mrb[103].mxu1  ;;  %4781 = vmatprep.subr.bf16.mxu0 %v4780_v2 }
 0x53c   :  { %4461 = vmatmul.mubr.msk.f32.vlgmr.msra.gmra.mrb[84].mxu0 %vm446_vm2, %v1582_v6 }
 0x53d   :  { %v1540_v11 = vpop.f32.mrb[104].mxu1  ;;  %4783 = vmatpush3.bf16.msra.mxu0 %v4780_v2 }
 0x53e   :  { %v1583_v12 = vmax.f32 %v1540_v11, 0.0  ;;  %v1542_v13 = vpop.f32.mrb[105].mxu1  ;;  %4785 = vmatprep.subr.bf16.mxu0 %v4784_v8 }
 0x540   :  { %4471 = vmatprep.mubr.msk.f32.mxu0 %vm446_vm2, %v1583_v12 }
 0x541   :  { %v1545_v17 = vpop.f32.mrb[106].mxu1  ;;  %4787 = vmatpush3.bf16.msra.mxu0 %v4784_v8 }
 0x542   :  { %v1584_v18 = vmax.f32 %v1545_v17, 0.0  ;;  %v1547_v19 = vpop.f32.mrb[107].mxu1  ;;  %4789 = vmatprep.subr.bf16.mxu0 %v4788_v14 }
 0x544   :  { %4472 = vmatmul.mubr.msk.f32.vlgmr.msra.gmra.mrb[84].mxu0 %vm446_vm2, %v1584_v18 }
 0x545   :  { %v1550_v21 = vpop.f32.mrb[108].mxu1  ;;  %4791 = vmatpush3.bf16.msra.mxu0 %v4788_v14 }
 0x546   :  { %v1585_v25 = vmax.f32 %v1550_v21, 0.0  ;;  %v1552_v26 = vpop.f32.mrb[109].mxu1  ;;  %4793 = vmatprep.subr.bf16.mxu0 %v4792_v20 }
 0x548   :  { %4482 = vmatprep.mubr.msk.f32.mxu0 %vm446_vm2, %v1585_v25 }
 0x549   :  { %v1555_v27 = vpop.f32.mrb[110].mxu1  ;;  %4795 = vmatpush3.bf16.msra.mxu0 %v4792_v20 }
 0x54a   :  { %v1586_v31 = vmax.f32 %v1555_v27, 0.0  ;;  %v1557_v32 = vpop.f32.mrb[111].mxu1  ;;  %4838 = vmatprep.subr.bf16.mxu0 %v6168_v23 }
 0x54c   :  { %4483 = vmatmul.mubr.msk.f32.vlgmr.msra.gmra.mrb[84].mxu0 %vm446_vm2, %v1586_v31 }
 0x54d   :  { %v2886_v38 = vpop.f32.mrb[112].mxu1  ;;  %4840 = vmatpush3.bf16.msra.mxu0 %v5717_v37  ;;  %4570 = vmatprep.mubr.msk.f32.mxu0 %vm4932_vm4, %v4933_v50 }
 0x54e   :  { %v2905_v22 = vadd.f32 %v6011_v33, %v2886_v38  ;;  %v4495_v39 = vpop.f32.mrb[113].mxu1  ;;  %4841 = vmatprep.subr.bf16.mxu0 %v6168_v23 }
 0x550   :  { %2907 = vrot.lane.b32.xlu0 %v2905_v22, %s4934_s23 }
 0x551   :  { %4843 = vmatpush3.bf16.msra.mxu0 %v5730_v40 }
 0x5c2   :  { %v2908_v44 = vpop.permute.xlu0 %2907 }
 0x61f   :  { %v4484_v28 = vpop.f32.mrb[84].mxu0 }
 0x620   :  { %v6024_v34 = vadd.f32 %v4484_v28, %v3920_v41  ;;  %v2801_v24 = vpop.f32.mrb[85].mxu0 }
 0x621   :  { %v6026_v35 = vadd.f32 %v3920_v41, %v2801_v24 }
 0x623   :  { %v2890_v36 = vadd.f32 %v6026_v35, %v2886_v38 }
 0x625   :  { %v3947_v29 = vmul.f32 -1.442695, %v2890_v36 }
 0x627   :  { %4883 = vpow2.f32 %v3947_v29 }
 0x631   :  { %v4884_v42 = vpop.eup %4883 }
 0x632   :  { %v2894_v43 = vadd.f32 1.0, %v4884_v42 }
 0x634   :  { %4885 = vrcp.f32 %v2894_v43 }
 0x63e   :  { %v4886_v30 = vpop.eup %4885 }
 0x63f   :  { %v2910_v45 = vmul.f32 %v4886_v30, %v2908_v44  ;;  %v2917_v49 = vsub.f32 1.0, %v4886_v30  ;;  %v2923_v52 = vmul.f32 0.0, %v4886_v30 }
 0x641   :  { %2912 = vrot.lane.b32.xlu1 %v2910_v45, %s4934_s23 }
 0x6b3   :  { %v2913_v46 = vpop.permute.xlu1 %2912 }
 0x6b4   :  { %v2915_v47 = vadd.f32 %v6026_v35, %v2913_v46 }
 0x6b6   :  { %4887 = vtanh.f32 %v2915_v47 }
 0x6c0   :  { %v4888_v48 = vpop.eup %4887 }
 0x6c1   :  { %2919 = vrot.lane.b32.xlu1 %v4888_v48, %s4935_s9 }
 0x733   :  { %v2920_v51 = vpop.permute.xlu1 %2919 }
 0x734   :  { %v2922_v53 = vmul.f32 %v2920_v51, %v2917_v49 }
 0x736   :  { %v2924_v54 = vadd.f32 %v2923_v52, %v2922_v53 }
 0x738   :  { %2926 = vrot.lane.b32.xlu0 %v2924_v54, %s4935_s9  ;;  %v3029_v7 = vrot.slane %v2924_v54, 6 }
 0x7aa   :  { %v2927_v55 = vpop.permute.xlu0 %2926 }
 0x7ab   :  { %4505 = vmatmul.mubr.msk.f32.vlgmr.msra.gmra.mrb[114].mxu1 %vm446_vm2, %v2927_v55 }
 0x7ac   :  { %4810 = vmatpush3.bf16.msra.mxu1 %v5717_v37  ;;  %4515 = vmatprep.mubr.msk.f32.mxu1 %vm4932_vm4, %v4933_v50 }
 0x7ad   :  { %4811 = vmatprep.subr.bf16.mxu1 %v6168_v23 }
 0x7b0   :  { %4813 = vmatpush3.bf16.msra.mxu1 %v5730_v40 }
 0x7b1   :  { %4814 = vmatprep.subr.bf16.mxu1 %v6168_v23 }
 0x87e   :  { %v2996_v56 = vpop.f32.mrb[114].mxu1 }
 0x87f   :  { %v3010_v57 = vadd.f32 %v2996_v56, %v6011_v33  ;;  %v4506_v58 = vpop.f32.mrb[115].mxu1  ;;  %v3001_v60 = vrot.slane %v2996_v56, 6 }
 0x881   :  { %v3012_v59 = vrot.slane %v3010_v57, 6  ;;  %v3003_v61 = vadd.f32 %v6026_v35, %v3001_v60 }
 0x883   :  { %3013 = vrot.lane.b32.xlu1 %v3012_v59, %s4934_s23  ;;  %v3950_v62 = vmul.f32 -1.442695, %v3003_v61 }
 0x885   :  { %4889 = vpow2.f32 %v3950_v62 }
 0x88f   :  { %v4890_v63 = vpop.eup %4889 }
 0x890   :  { %v3007_v0 = vadd.f32 1.0, %v4890_v63 }
 0x892   :  { %4891 = vrcp.f32 %v3007_v0 }
 0x89c   :  { %v4892_v1 = vpop.eup %4891 }
 0x89d   :  { %v3023_v8 = vsub.f32 1.0, %v4892_v1  ;;  %v3031_v11 = vmul.f32 %v4892_v1, %v3029_v7 }
 0x8f5   :  { %v3014_v2 = vpop.permute.xlu1 %3013 }
 0x8f6   :  { %v3016_v3 = vmul.f32 %v4892_v1, %v3014_v2 }
 0x8f8   :  { %3018 = vrot.lane.b32.xlu0 %v3016_v3, %s4934_s23 }
 0x96a   :  { %v3019_v4 = vpop.permute.xlu0 %3018 }
 0x96b   :  { %v3021_v5 = vadd.f32 %v6026_v35, %v3019_v4 }
 0x96d   :  { %4893 = vtanh.f32 %v3021_v5 }
 0x977   :  { %v4894_v6 = vpop.eup %4893 }
 0x978   :  { %3025 = vrot.lane.b32.xlu1 %v4894_v6, %s4935_s9 }
 0x9ea   :  { %v3026_v9 = vpop.permute.xlu1 %3025 }
 0x9eb   :  { %v3028_v10 = vmul.f32 %v3026_v9, %v3023_v8 }
 0x9ed   :  { %v3032_v12 = vadd.f32 %v3031_v11, %v3028_v10 }
 0x9ef   :  { %v3034_v13 = vrot.slane %v3032_v12, 2  ;;  %v3138_v41 = vrot.slane %v3032_v12, 6 }
 0x9f1   :  { %3035 = vrot.lane.b32.xlu0 %v3034_v13, %s4935_s9 }
 0xa63   :  { %v3036_v14 = vpop.permute.xlu0 %3035 }
 0xa64   :  { %4516 = vmatmul.mubr.msk.f32.vlgmr.msra.gmra.mrb[116].mxu1 %vm446_vm2, %v3036_v14 }
 0xa65   :  { %4816 = vmatpush3.bf16.msra.mxu1 %v5717_v37  ;;  %4526 = vmatprep.mubr.msk.f32.mxu1 %vm4932_vm4, %v4933_v50 }
 0xa66   :  { %4817 = vmatprep.subr.bf16.mxu1 %v6168_v23 }
 0xa69   :  { %4819 = vmatpush3.bf16.msra.mxu1 %v5730_v40 }
 0xa6a   :  { %4820 = vmatprep.subr.bf16.mxu1 %v6168_v23 }
 0xb37   :  { %v3105_v15 = vpop.f32.mrb[116].mxu1 }
 0xb38   :  { %v3119_v16 = vadd.f32 %v3105_v15, %v6011_v33  ;;  %v4517_v17 = vpop.f32.mrb[117].mxu1  ;;  %v3110_v19 = vrot.slane %v3105_v15, 4 }
 0xb3a   :  { %v3121_v18 = vrot.slane %v3119_v16, 4  ;;  %v3112_v20 = vadd.f32 %v6026_v35, %v3110_v19 }
 0xb3c   :  { %3122 = vrot.lane.b32.xlu1 %v3121_v18, %s4934_s23  ;;  %v3952_v21 = vmul.f32 -1.442695, %v3112_v20 }
 0xb3e   :  { %4895 = vpow2.f32 %v3952_v21 }
 0xb48   :  { %v4896_v25 = vpop.eup %4895 }
 0xb49   :  { %v3116_v26 = vadd.f32 1.0, %v4896_v25 }
 0xb4b   :  { %4897 = vrcp.f32 %v3116_v26 }
 0xb55   :  { %v4898_v27 = vpop.eup %4897 }
 0xb56   :  { %v3132_v28 = vsub.f32 1.0, %v4898_v27  ;;  %v3140_v36 = vmul.f32 %v4898_v27, %v3138_v41 }
 0xbae   :  { %v3123_v31 = vpop.permute.xlu1 %3122 }
 0xbaf   :  { %v3125_v32 = vmul.f32 %v4898_v27, %v3123_v31 }
 0xbb1   :  { %3127 = vrot.lane.b32.xlu0 %v3125_v32, %s4934_s23 }
 0xc23   :  { %v3128_v38 = vpop.permute.xlu0 %3127 }
 0xc24   :  { %v3130_v22 = vadd.f32 %v6026_v35, %v3128_v38 }
 0xc26   :  { %4899 = vtanh.f32 %v3130_v22 }
 0xc30   :  { %v4900_v39 = vpop.eup %4899 }
 0xc31   :  { %3134 = vrot.lane.b32.xlu1 %v4900_v39, %s4935_s9 }
 0xca3   :  { %v3135_v24 = vpop.permute.xlu1 %3134 }
 0xca4   :  { %v3137_v29 = vmul.f32 %v3135_v24, %v3132_v28 }
 0xca6   :  { %v3141_v42 = vadd.f32 %v3140_v36, %v3137_v29 }
 0xca8   :  { %v3143_v43 = vrot.slane %v3141_v42, 4  ;;  %v3247_v60 = vrot.slane %v3141_v42, 6 }
 0xcaa   :  { %3144 = vrot.lane.b32.xlu0 %v3143_v43, %s4935_s9 }
 0xd1c   :  { %v3145_v44 = vpop.permute.xlu0 %3144 }
 0xd1d   :  { %4527 = vmatmul.mubr.msk.f32.vlgmr.msra.gmra.mrb[118].mxu1 %vm446_vm2, %v3145_v44 }
 0xd1e   :  { %4822 = vmatpush3.bf16.msra.mxu1 %v5717_v37  ;;  %4537 = vmatprep.mubr.msk.f32.mxu1 %vm4932_vm4, %v4933_v50 }
 0xd1f   :  { %4823 = vmatprep.subr.bf16.mxu1 %v6168_v23 }
 0xd22   :  { %4825 = vmatpush3.bf16.msra.mxu1 %v5730_v40 }
 0xd23   :  { %4826 = vmatprep.subr.bf16.mxu1 %v6168_v23 }
 0xdf0   :  { %v3214_v30 = vpop.f32.mrb[118].mxu1 }
 0xdf1   :  { %v3228_v45 = vadd.f32 %v3214_v30, %v6011_v33  ;;  %v4528_v46 = vpop.f32.mrb[119].mxu1  ;;  %v3219_v48 = vrot.slane %v3214_v30, 2 }
 0xdf3   :  { %v3230_v47 = vrot.slane %v3228_v45, 2  ;;  %v3221_v49 = vadd.f32 %v6026_v35, %v3219_v48 }
 0xdf5   :  { %3231 = vrot.lane.b32.xlu1 %v3230_v47, %s4934_s23  ;;  %v3954_v51 = vmul.f32 -1.442695, %v3221_v49 }
 0xdf7   :  { %4901 = vpow2.f32 %v3954_v51 }
 0xe01   :  { %v4902_v52 = vpop.eup %4901 }
 0xe02   :  { %v3225_v53 = vadd.f32 1.0, %v4902_v52 }
 0xe04   :  { %4903 = vrcp.f32 %v3225_v53 }
 0xe0e   :  { %v4904_v54 = vpop.eup %4903 }
 0xe0f   :  { %v3241_v61 = vsub.f32 1.0, %v4904_v54  ;;  %v3249_v63 = vmul.f32 %v4904_v54, %v3247_v60 }
 0xe67   :  { %v3232_v55 = vpop.permute.xlu1 %3231 }
 0xe68   :  { %v3234_v56 = vmul.f32 %v4904_v54, %v3232_v55 }
 0xe6a   :  { %3236 = vrot.lane.b32.xlu0 %v3234_v56, %s4934_s23 }
 0xedc   :  { %v3237_v57 = vpop.permute.xlu0 %3236 }
 0xedd   :  { %v3239_v58 = vadd.f32 %v6026_v35, %v3237_v57 }
 0xedf   :  { %4905 = vtanh.f32 %v3239_v58 }
 0xee9   :  { %v4906_v59 = vpop.eup %4905 }
 0xeea   :  { %3243 = vrot.lane.b32.xlu1 %v4906_v59, %s4935_s9 }
 0xf5c   :  { %v3244_v62 = vpop.permute.xlu1 %3243 }
 0xf5d   :  { %v3246_v0 = vmul.f32 %v3244_v62, %v3241_v61 }
 0xf5f   :  { %v3250_v1 = vadd.f32 %v3249_v63, %v3246_v0 }
 0xf61   :  { %v3252_v2 = vrot.slane %v3250_v1, 6 }
 0xf63   :  { %3253 = vrot.lane.b32.xlu0 %v3252_v2, %s4935_s9 }
 0xfd5   :  { %v3254_v3 = vpop.permute.xlu0 %3253 }
 0xfd6   :  { %4538 = vmatmul.mubr.msk.f32.vlgmr.msra.gmra.mrb[120].mxu1 %vm446_vm2, %v3254_v3 }
 0xfd7   :  { %4828 = vmatpush3.bf16.msra.mxu1 %v5717_v37  ;;  %4548 = vmatprep.mubr.msk.f32.mxu1 %vm4932_vm4, %v4933_v50 }
 0xfd8   :  { %4829 = vmatprep.subr.bf16.mxu1 %v6168_v23 }
 0xfdb   :  { %4831 = vmatpush3.bf16.msra.mxu1 %v5730_v40 }
 0xfdc   :  { %4832 = vmatprep.subr.bf16.mxu1 %v6168_v23 }
0x10a9   :  { %v3323_v35 = vpop.f32.mrb[120].mxu1 }
0x10aa   :  { %v3334_v4 = vadd.f32 %v3323_v35, %v6011_v33  ;;  %v4539_v5 = vpop.f32.mrb[121].mxu1  ;;  %v3327_v6 = vadd.f32 %v6024_v34, %v3323_v35 }
0x10ac   :  { %3336 = vrot.lane.b32.xlu1 %v3334_v4, %s4934_s23  ;;  %v3956_v7 = vmul.f32 -1.442695, %v3327_v6 }
0x10ae   :  { %4907 = vpow2.f32 %v3956_v7 }
0x10b8   :  { %v4908_v8 = vpop.eup %4907 }
0x10b9   :  { %v3331_v9 = vadd.f32 1.0, %v4908_v8 }
0x10bb   :  { %4909 = vrcp.f32 %v3331_v9 }
0x10c5   :  { %v4910_v10 = vpop.eup %4909 }
0x10c6   :  { %v3346_v16 = vsub.f32 1.0, %v4910_v10  ;;  %v3353_v18 = vmul.f32 %v4910_v10, %v3252_v2 }
0x111e   :  { %v3337_v11 = vpop.permute.xlu1 %3336 }
0x111f   :  { %v3339_v12 = vmul.f32 %v4910_v10, %v3337_v11 }
0x1121   :  { %3341 = vrot.lane.b32.xlu0 %v3339_v12, %s4934_s23 }
0x1193   :  { %v3342_v13 = vpop.permute.xlu0 %3341 }
0x1194   :  { %v3344_v14 = vadd.f32 %v6024_v34, %v3342_v13 }
0x1196   :  { %4911 = vtanh.f32 %v3344_v14 }
0x11a0   :  { %v4912_v15 = vpop.eup %4911 }
0x11a1   :  { %3348 = vrot.lane.b32.xlu1 %v4912_v15, %s4935_s9 }
0x1213   :  { %v3349_v17 = vpop.permute.xlu1 %3348 }
0x1214   :  { %v3351_v19 = vmul.f32 %v3349_v17, %v3346_v16 }
0x1216   :  { %v3354_v20 = vadd.f32 %v3353_v18, %v3351_v19 }
0x1218   :  { %3356 = vrot.lane.b32.xlu0 %v3354_v20, %s4935_s9  ;;  %v3459_v42 = vrot.slane %v3354_v20, 6  ;;  %v3681_v20 = vld [vmem:[%s6153_s12] sm:$0xff] }
0x128a   :  { %v3357_v21 = vpop.permute.xlu0 %3356 }
0x128b   :  { %4549 = vmatmul.mubr.msk.f32.vlgmr.msra.gmra.mrb[122].mxu1 %vm446_vm2, %v3357_v21  ;;  %v3682_v21 = vld [vmem:[%s6153_s12 + $0x8] sm:$0xff] }
0x128c   :  { %4834 = vmatpush3.bf16.msra.mxu1 %v5717_v37  ;;  %4559 = vmatprep.mubr.msk.f32.mxu1 %vm4932_vm4, %v4933_v50 }
0x128d   :  { %4835 = vmatprep.subr.bf16.mxu1 %v6168_v23 }
0x1290   :  { %4837 = vmatpush3.bf16.msra.mxu1 %v5730_v40 }
0x1291   :  { %4844 = vmatprep.subr.bf16.mxu1 %v6168_v23 }
0x135e   :  { %v3426_v25 = vpop.f32.mrb[122].mxu1 }
0x135f   :  { %v3440_v26 = vadd.f32 %v3426_v25, %v6011_v33  ;;  %v4550_v27 = vpop.f32.mrb[123].mxu1  ;;  %v3431_v32 = vrot.slane %v3426_v25, 6  ;;  %v3683_v25 = vld [vmem:[%s6153_s12 + $0x10] sm:$0xff] }
0x1360   :  { %v3684_v27 = vld [vmem:[%s6153_s12 + $0x18] sm:$0xff] }
0x1361   :  { %v3442_v31 = vrot.slane %v3440_v26, 6  ;;  %v3433_v38 = vadd.f32 %v6024_v34, %v3431_v32  ;;  %v4845_v26 = vpack.c.bf16 %v3682_v21, %v3681_v20  ;;  %v19_v32 = vstv %s6154_s13 }
0x1362   :  { %20 = vst [vmem:[#allocation2] sm:$0x1] %v19_v32 }
0x1363   :  { %3443 = vrot.lane.b32.xlu1 %v3442_v31, %s4934_s23  ;;  %v3958_v37 = vmul.f32 -1.442695, %v3433_v38 }
0x1365   :  { %4913 = vpow2.f32 %v3958_v37 }
0x136f   :  { %v4914_v22 = vpop.eup %4913 }
0x1370   :  { %v3437_v39 = vadd.f32 1.0, %v4914_v22 }
0x1372   :  { %4915 = vrcp.f32 %v3437_v39 }
0x137c   :  { %v4916_v41 = vpop.eup %4915 }
0x137d   :  { %v3453_v43 = vsub.f32 1.0, %v4916_v41  ;;  %v3461_v30 = vmul.f32 %v4916_v41, %v3459_v42 }
0x13d5   :  { %v3444_v28 = vpop.permute.xlu1 %3443 }
0x13d6   :  { %v3446_v40 = vmul.f32 %v4916_v41, %v3444_v28 }
0x13d8   :  { %3448 = vrot.lane.b32.xlu0 %v3446_v40, %s4934_s23 }
0x144a   :  { %v3449_v24 = vpop.permute.xlu0 %3448 }
0x144b   :  { %v3451_v36 = vadd.f32 %v6024_v34, %v3449_v24 }
0x144d   :  { %4917 = vtanh.f32 %v3451_v36 }
0x1457   :  { %v4918_v29 = vpop.eup %4917 }
0x1458   :  { %3455 = vrot.lane.b32.xlu1 %v4918_v29, %s4935_s9 }
0x14ca   :  { %v3456_v44 = vpop.permute.xlu1 %3455 }
0x14cb   :  { %v3458_v45 = vmul.f32 %v3456_v44, %v3453_v43 }
0x14cd   :  { %v3462_v46 = vadd.f32 %v3461_v30, %v3458_v45 }
0x14cf   :  { %v3464_v47 = vrot.slane %v3462_v46, 2  ;;  %v3568_v0 = vrot.slane %v3462_v46, 6 }
0x14d1   :  { %3465 = vrot.lane.b32.xlu0 %v3464_v47, %s4935_s9 }
0x1543   :  { %v3466_v48 = vpop.permute.xlu0 %3465 }
0x1544   :  { %4560 = vmatmul.mubr.msk.f32.vlgmr.msra.gmra.mrb[124].mxu1 %vm446_vm2, %v3466_v48 }
0x1545   :  { %4581 = vmatprep.mubr.msk.f32.mxu1 %vm4932_vm4, %v4933_v50  ;;  %4846 = vmatpush3.bf16.msra.mxu1 %v4845_v26 }
0x1546   :  { %4847 = vmatprep.subr.bf16.mxu1 %v6168_v23  ;;  %v3963_v23 = vld [vmem:[#allocation2] ss:$0 sm:$0xff] }
0x1617   :  { %v3535_v49 = vpop.f32.mrb[124].mxu1 }
0x1618   :  { %v3549_v51 = vadd.f32 %v3535_v49, %v6011_v33  ;;  %v4561_v52 = vpop.f32.mrb[125].mxu1  ;;  %v3540_v54 = vrot.slane %v3535_v49, 4 }
0x161a   :  { %v3551_v53 = vrot.slane %v3549_v51, 4  ;;  %v3542_v55 = vadd.f32 %v6024_v34, %v3540_v54 }
0x161c   :  { %3552 = vrot.lane.b32.xlu1 %v3551_v53, %s4934_s23  ;;  %v3960_v56 = vmul.f32 -1.442695, %v3542_v55 }
0x161e   :  { %4919 = vpow2.f32 %v3960_v56 }
0x1628   :  { %v4920_v57 = vpop.eup %4919 }
0x1629   :  { %v3546_v58 = vadd.f32 1.0, %v4920_v57 }
0x162b   :  { %4921 = vrcp.f32 %v3546_v58 }
0x1635   :  { %v4922_v59 = vpop.eup %4921 }
0x1636   :  { %v3562_v1 = vsub.f32 1.0, %v4922_v59  ;;  %v3570_v3 = vmul.f32 %v4922_v59, %v3568_v0 }
0x168e   :  { %v3553_v60 = vpop.permute.xlu1 %3552 }
0x168f   :  { %v3555_v61 = vmul.f32 %v4922_v59, %v3553_v60 }
0x1691   :  { %3557 = vrot.lane.b32.xlu0 %v3555_v61, %s4934_s23 }
0x1703   :  { %v3558_v50 = vpop.permute.xlu0 %3557 }
0x1704   :  { %v3560_v62 = vadd.f32 %v6024_v34, %v3558_v50 }
0x1706   :  { %4923 = vtanh.f32 %v3560_v62 }
0x1710   :  { %v4924_v63 = vpop.eup %4923 }
0x1711   :  { %3564 = vrot.lane.b32.xlu1 %v4924_v63, %s4935_s9 }
0x1783   :  { %v3565_v2 = vpop.permute.xlu1 %3564 }
0x1784   :  { %v3567_v35 = vmul.f32 %v3565_v2, %v3562_v1 }
0x1786   :  { %v3571_v4 = vadd.f32 %v3570_v3, %v3567_v35 }
0x1788   :  { %v3573_v5 = vrot.slane %v3571_v4, 4  ;;  %v3677_v38 = vrot.slane %v3571_v4, 6 }
0x178a   :  { %3574 = vrot.lane.b32.xlu0 %v3573_v5, %s4935_s9 }
0x17fc   :  { %v3575_v6 = vpop.permute.xlu0 %3574 }
0x17fd   :  { %4571 = vmatmul.mubr.msk.f32.vlgmr.msra.gmra.mrb[86].mxu0 %vm446_vm2, %v3575_v6 }
0x18d0   :  { %v3644_v7 = vpop.f32.mrb[86].mxu0 }
0x18d1   :  { %v3658_v8 = vadd.f32 %v3644_v7, %v6011_v33  ;;  %v4572_v9 = vpop.f32.mrb[87].mxu0  ;;  %v3649_v11 = vrot.slane %v3644_v7, 2 }
0x18d3   :  { %v3660_v10 = vrot.slane %v3658_v8, 2  ;;  %v3651_v12 = vadd.f32 %v6024_v34, %v3649_v11 }
0x18d5   :  { %3661 = vrot.lane.b32.xlu1 %v3660_v10, %s4934_s23  ;;  %v3962_v13 = vmul.f32 -1.442695, %v3651_v12 }
0x18d7   :  { %4925 = vpow2.f32 %v3962_v13 }
0x18e1   :  { %v4926_v14 = vpop.eup %4925 }
0x18e2   :  { %v3655_v15 = vadd.f32 1.0, %v4926_v14 }
0x18e4   :  { %4927 = vrcp.f32 %v3655_v15 }
0x18ee   :  { %v4928_v16 = vpop.eup %4927 }
0x18ef   :  { %v3671_v37 = vsub.f32 1.0, %v4928_v16  ;;  %v3679_v39 = vmul.f32 %v4928_v16, %v3677_v38 }
0x1947   :  { %v3662_v17 = vpop.permute.xlu1 %3661 }
0x1948   :  { %v3664_v18 = vmul.f32 %v4928_v16, %v3662_v17 }
0x194a   :  { %3666 = vrot.lane.b32.xlu0 %v3664_v18, %s4934_s23 }
0x19bc   :  { %v3667_v19 = vpop.permute.xlu0 %3666 }
0x19bd   :  { %v3669_v33 = vadd.f32 %v6024_v34, %v3667_v19  ;;  %v4848_v34 = vpack.c.bf16 %v3684_v27, %v3683_v25 }
0x19bf   :  { %4929 = vtanh.f32 %v3669_v33  ;;  %4849 = vmatpush3.bf16.msra.mxu1 %v4848_v34 }
0x19c9   :  { %v4930_v31 = vpop.eup %4929 }
0x19ca   :  { %3673 = vrot.lane.b32.xlu1 %v4930_v31, %s4935_s9 }
0x1a3c   :  { %v3674_v22 = vpop.permute.xlu1 %3673 }
0x1a3d   :  { %v3676_v41 = vmul.f32 %v3674_v22, %v3671_v37 }
0x1a3f   :  { %v3680_v28 = vadd.f32 %v3679_v39, %v3676_v41 }
0x1a41   :  { %v3693_v40 = vrot.slane %v3680_v28, 6 }
0x1a43   :  { %3694 = vrot.lane.b32.xlu0 %v3693_v40, %s4935_s9 }
0x1ab5   :  { %v3695_v24 = vpop.permute.xlu0 %3694 }
0x1ab6   :  { %4582 = vmatmul.mubr.msk.f32.vlgmr.msra.gmra.mrb[126].mxu1 %vm446_vm2, %v3695_v24 }
0x1b89   :  { %v3764_v36 = vpop.f32.mrb[126].mxu1 }
0x1b8a   :  { %v3765_v29 = vadd.f32 %v3963_v23, %v3764_v36  ;;  %v4583_v42 = vpop.f32.mrb[127].mxu1 }
0x1b8c   :  { %3769 = vst.msk [vmem:[%s6155_s14] sm:$0x3] %vm3768_vm5, %v3765_v29 }

</bundles_post_ra>
